<compile_context>
chip_gen: v5e
topology: v5e:2x2
jax: 0.10.0
libtpu: 0.0.40
codegen_flags: <defaults>
</compile_context>

<pallas_src>
import math

import jax
import jax.numpy as jnp
import numpy as np
from jax.experimental import pallas as pl
from jax.experimental.pallas import tpu as pltpu


def shuffle_plug_7_forward(x, w1s, w2s, w3, b3, bn_stats):
    """x: (B, C, S, S) f32. w1s/w2s: already-softmaxed (S, S) pointwise weights.
    w3: (C, 1, 3, 3) depthwise conv weight, b3: (C,) bias.
    bn_stats: [(gamma, beta, mean, var)] for bn1, bn2, bn3 (each (C,))."""
    B, C, S, S2 = x.shape
    assert S == S2
    # The module only makes sense if in_ch1 == out_ch1 == spatial size.
    assert w1s.shape == (S, S) and w2s.shape == (S, S)
    assert w3.shape == (C, 1, 3, 3) and b3.shape == (C,)

    eps = 1e-5
    (g1, be1, m1, v1), (g2, be2, m2, v2), (g3, be3, m3, v3) = bn_stats
    s1 = g1 / jnp.sqrt(v1 + eps)
    sh1 = be1 - m1 * s1
    s2 = g2 / jnp.sqrt(v2 + eps)
    sh2 = be2 - m2 * s2
    s3 = g3 / jnp.sqrt(v3 + eps)
    sh3 = be3 - m3 * s3

    R = C * S  # flattened (channel, row) axis

    def rows(v):  # per-channel (C,) -> per-row (C*S, 1) lane-broadcast vector
        return jnp.repeat(v.astype(jnp.float32), S)[:, None]

    # Weight preprocessing (all folded once, outside the kernel).
    w1t = w1s.T.astype(jnp.float32)                                   # (S, S)
    # block-diag over channels with bn2 scale folded in: kron(diag(s2), W2)
    w2big = jnp.kron(jnp.diag(s2).astype(jnp.float32),
                     w2s.astype(jnp.float32))                         # (C*S, C*S)
    s1_rows = rows(s1)                                                # (C*S, 1)
    sh12_rows = rows(sh1 + sh2)                                       # (C*S, 1)
    # 3x3 taps pre-scaled by bn3 scale, expanded to per-row vectors.
    k9 = (s3[:, None] * w3.reshape(C, 9)).astype(jnp.float32)         # (C, 9)
    ktap_rows = jnp.repeat(k9.T, S, axis=1)[:, :, None]               # (9, C*S, 1)
    bias3_rows = rows(s3 * b3 + sh3)                                  # (C*S, 1)

    x_flat = x.reshape(B, R, S).astype(jnp.float32)                   # (B, C*S, S)

    def kernel(x_ref, w1t_ref, w2b_ref, s1_ref, sh12_ref, kt_ref, b3r_ref, o_ref):
        xf = x_ref[0]                                                 # (C*S, S)

        # --- the two softmax-pointwise "convs", batched over all channels ---
        y1 = jnp.dot(xf, w1t_ref[...], preferred_element_type=jnp.float32)
        y2 = jnp.dot(w2b_ref[...], xf, preferred_element_type=jnp.float32)
        # bn1 scale (per-row), bn2 scale already folded into w2big, shared shift
        y = s1_ref[...] * y1 + y2 + sh12_ref[...]                     # (C*S, S)

        # --- depthwise 3x3 conv, stride 1, zero padding 1, groups = C ---
        # zero-pad each channel's (S, S) plane, then take 9 static shifted
        # slices (pure VPU/XLU work, no MXU, no boundary masks needed).
        y3 = y.reshape(C, S, S)
        zc = jnp.zeros((C, S, 1), jnp.float32)
        zr = jnp.zeros((C, 1, S + 2), jnp.float32)
        yp = jnp.concatenate([zc, y3, zc], axis=2)                    # (C, S, S+2)
        yp = jnp.concatenate([zr, yp, zr], axis=1)                    # (C, S+2, S+2)

        acc = jnp.zeros((R, S), jnp.float32) + b3r_ref[...]           # bias (bn3 folded)
        for a in range(3):
            for b in range(3):
                tap = yp[:, a:a + S, b:b + S].reshape(R, S)
                acc = acc + kt_ref[3 * a + b] * tap                   # per-row FMA

        # --- bn3 already folded; exact (erf) GELU ---
        o_ref[0] = 0.5 * acc * (1.0 + jax.lax.erf(acc * (1.0 / math.sqrt(2.0))))

    grid_spec = pltpu.PrefetchScalarGridSpec(
        num_scalar_prefetch=0,
        grid=(B,),
        in_specs=[
            pl.BlockSpec((1, R, S), lambda b: (b, 0, 0)),      # x slab for batch b
            pl.BlockSpec((S, S), lambda b: (0, 0)),            # w1^T
            pl.BlockSpec((R, R), lambda b: (0, 0)),            # blockdiag(s2*w2)
            pl.BlockSpec((R, 1), lambda b: (0, 0)),            # bn1 scale rows
            pl.BlockSpec((R, 1), lambda b: (0, 0)),            # bn1+bn2 shift rows
            pl.BlockSpec((9, R, 1), lambda b: (0, 0, 0)),      # 3x3 taps (bn3-scaled)
            pl.BlockSpec((R, 1), lambda b: (0, 0)),            # conv bias + bn3 shift
        ],
        out_specs=pl.BlockSpec((1, R, S), lambda b: (b, 0, 0)),
    )
    out_flat = pl.pallas_call(
        kernel,
        out_shape=jax.ShapeDtypeStruct((B, R, S), jnp.float32),
        grid_spec=grid_spec,
        compiler_params=pltpu.CompilerParams(
            dimension_semantics=("parallel",)),
    )(x_flat, w1t, w2big, s1_rows, sh12_rows, ktap_rows, bias3_rows)
    return out_flat.reshape(B, C, S, S)


def _reference(x, w1s, w2s, w3, b3, bn_stats):
    """Pure-JAX reference of the PyTorch forward (eval-mode BN)."""
    B, C, S, _ = x.shape

    def bn(y, p):
        gamma, beta, mean, var = p
        s = gamma / jnp.sqrt(var + 1e-5)
        return y * s[None, :, None, None] + (beta - mean * s)[None, :, None, None]

    y1 = jnp.einsum('bcpj,qj->bcpq', x, w1s)
    y2 = jnp.einsum('pi,bciq->bcpq', w2s, x)
    y = bn(y1, bn_stats[0]) + bn(y2, bn_stats[1])

    yp = jnp.pad(y, ((0, 0), (0, 0), (1, 1), (1, 1)))
    conv = jnp.zeros_like(y) + b3[None, :, None, None]
    for a in range(3):
        for bb in range(3):
            conv = conv + (w3[:, 0, a, bb][None, :, None, None]
                           * yp[:, :, a:a + S, bb:bb + S])
    z = bn(conv, bn_stats[2])
    return 0.5 * z * (1.0 + jax.lax.erf(z / jnp.sqrt(2.0)))


if __name__ == "__main__":
    # Shapes implied by the module: x (B, bn_ch, S, S) with in_ch1 == out_ch1 == S.
    B, bn_ch, S = 2, 4, 16
    key = jax.random.PRNGKey(0)
    kx, k1, k2, k3w, k3b = jax.random.split(key, 5)

    x = jax.random.normal(kx, (B, bn_ch, S, S), jnp.float32)

    # SoftMaxPointwiseConv weights: kaiming_uniform(a=sqrt(5)) => U(-1/sqrt(fan_in), +)
    bound_pw = 1.0 / math.sqrt(S)
    w1 = jax.random.uniform(k1, (S, S), jnp.float32, -bound_pw, bound_pw)
    w2 = jax.random.uniform(k2, (S, S), jnp.float32, -bound_pw, bound_pw)
    # forward does weight.data = softmax(weight, dim=1) before the conv
    w1s = jax.nn.softmax(w1, axis=1)
    w2s = jax.nn.softmax(w2, axis=1)

    # Depthwise 3x3 conv (groups=bn_ch): fan_in = 1*3*3 = 9
    bound_dw = 1.0 / 3.0
    w3 = jax.random.uniform(k3w, (bn_ch, 1, 3, 3), jnp.float32, -bound_dw, bound_dw)
    b3 = jax.random.uniform(k3b, (bn_ch,), jnp.float32, -bound_dw, bound_dw)

    # BatchNorm parameters at PyTorch init (eval mode): gamma=1, beta=0, mean=0, var=1
    ones = jnp.ones((bn_ch,), jnp.float32)
    zeros = jnp.zeros((bn_ch,), jnp.float32)
    bn_stats = [(ones, zeros, zeros, ones)] * 3

    fwd = jax.jit(shuffle_plug_7_forward)
    out = jax.block_until_ready(fwd(x, w1s, w2s, w3, b3, bn_stats))

    ref = _reference(x, w1s, w2s, w3, b3, bn_stats)
    np.testing.assert_allclose(np.asarray(out), np.asarray(ref), rtol=2e-2, atol=2e-2)
    assert out.shape == (B, bn_ch, S, S)
    print("KERNEL_OK")
</pallas_src>

<mosaic_0001>
module attributes {stable_mosaic.version = 11 : i64} {
  func.func @kernel(%arg0: i32, %arg1: memref<1x64x16xf32, #tpu.memory_space<vmem>>, %arg2: memref<16x16xf32, #tpu.memory_space<vmem>>, %arg3: memref<64x64xf32, #tpu.memory_space<vmem>>, %arg4: memref<64x1xf32, #tpu.memory_space<vmem>>, %arg5: memref<64x1xf32, #tpu.memory_space<vmem>>, %arg6: memref<9x64x1xf32, #tpu.memory_space<vmem>>, %arg7: memref<64x1xf32, #tpu.memory_space<vmem>>, %arg8: memref<1x64x16xf32, #tpu.memory_space<vmem>>) attributes {dimension_semantics = [#tpu.dimension_semantics<parallel>], iteration_bounds = array<i64: 2>, scalar_prefetch = 0 : i64, scratch_operands = 0 : i64, tpu.core_type = #tpu.core_type<tc>, window_params = [{transform_indices = @transform_0, window_bounds = array<i64: 1, 64, 16>}, {pipeline_mode = #tpu.pipeline_mode<synchronous>, transform_indices = @transform_1, window_bounds = array<i64: 16, 16>}, {pipeline_mode = #tpu.pipeline_mode<synchronous>, transform_indices = @transform_2, window_bounds = array<i64: 64, 64>}, {pipeline_mode = #tpu.pipeline_mode<synchronous>, transform_indices = @transform_3, window_bounds = array<i64: 64, 1>}, {pipeline_mode = #tpu.pipeline_mode<synchronous>, transform_indices = @transform_4, window_bounds = array<i64: 64, 1>}, {pipeline_mode = #tpu.pipeline_mode<synchronous>, transform_indices = @transform_5, window_bounds = array<i64: 9, 64, 1>}, {pipeline_mode = #tpu.pipeline_mode<synchronous>, transform_indices = @transform_6, window_bounds = array<i64: 64, 1>}, {transform_indices = @transform_7, window_bounds = array<i64: 1, 64, 16>}]} {
    %c0 = arith.constant 0 : index
    %c0_0 = arith.constant 0 : index
    %c0_1 = arith.constant 0 : index
    %0 = vector.load %arg1[%c0, %c0_0, %c0_1] : memref<1x64x16xf32, #tpu.memory_space<vmem>>, vector<1x64x16xf32>
    %1 = vector.shape_cast %0 : vector<1x64x16xf32> to vector<64x16xf32>
    %c0_2 = arith.constant 0 : index
    %c0_3 = arith.constant 0 : index
    %2 = vector.load %arg2[%c0_2, %c0_3] : memref<16x16xf32, #tpu.memory_space<vmem>>, vector<16x16xf32>
    %cst = arith.constant dense<0.000000e+00> : vector<64x16xf32>
    %3 = tpu.matmul %1, %2, %cst {dimension_numbers = #tpu.dot_dimension_numbers<[1], [0], [0], [1], [0, 0, 1, 1], [], []>} : vector<64x16xf32>, vector<16x16xf32>, vector<64x16xf32> -> vector<64x16xf32>
    %c0_4 = arith.constant 0 : index
    %c0_5 = arith.constant 0 : index
    %4 = vector.load %arg3[%c0_4, %c0_5] : memref<64x64xf32, #tpu.memory_space<vmem>>, vector<64x64xf32>
    %cst_6 = arith.constant dense<0.000000e+00> : vector<64x16xf32>
    %5 = tpu.matmul %4, %1, %cst_6 {dimension_numbers = #tpu.dot_dimension_numbers<[1], [0], [0], [1], [0, 0, 1, 1], [], []>} : vector<64x64xf32>, vector<64x16xf32>, vector<64x16xf32> -> vector<64x16xf32>
    %c0_7 = arith.constant 0 : index
    %c0_8 = arith.constant 0 : index
    %6 = vector.load %arg4[%c0_7, %c0_8] : memref<64x1xf32, #tpu.memory_space<vmem>>, vector<64x1xf32>
    %7 = vector.broadcast %6 : vector<64x1xf32> to vector<64x16xf32>
    %8 = arith.mulf %7, %3 : vector<64x16xf32>
    %9 = arith.addf %8, %5 : vector<64x16xf32>
    %c0_9 = arith.constant 0 : index
    %c0_10 = arith.constant 0 : index
    %10 = vector.load %arg5[%c0_9, %c0_10] : memref<64x1xf32, #tpu.memory_space<vmem>>, vector<64x1xf32>
    %11 = vector.broadcast %10 : vector<64x1xf32> to vector<64x16xf32>
    %12 = arith.addf %9, %11 : vector<64x16xf32>
    %13 = vector.shape_cast %12 : vector<64x16xf32> to vector<4x16x16xf32>
    %cst_11 = arith.constant 0.000000e+00 : f32
    %14 = vector.broadcast %cst_11 : f32 to vector<4x16x1xf32>
    %cst_12 = arith.constant 0.000000e+00 : f32
    %15 = vector.broadcast %cst_12 : f32 to vector<4x1x18xf32>
    %16 = tpu.concatenate %14, %13, %14 in 2 : vector<4x16x1xf32>, vector<4x16x16xf32>, vector<4x16x1xf32> -> vector<4x16x18xf32>
    %17 = tpu.concatenate %15, %16, %15 in 1 : vector<4x1x18xf32>, vector<4x16x18xf32>, vector<4x1x18xf32> -> vector<4x18x18xf32>
    %cst_13 = arith.constant 0.000000e+00 : f32
    %18 = vector.broadcast %cst_13 : f32 to vector<64x16xf32>
    %c0_14 = arith.constant 0 : index
    %c0_15 = arith.constant 0 : index
    %19 = vector.load %arg7[%c0_14, %c0_15] : memref<64x1xf32, #tpu.memory_space<vmem>>, vector<64x1xf32>
    %20 = vector.broadcast %19 : vector<64x1xf32> to vector<64x16xf32>
    %21 = arith.addf %18, %20 : vector<64x16xf32>
    %22 = vector.extract_strided_slice %17 {offsets = [0, 0, 0], sizes = [4, 16, 16], strides = [1, 1, 1]} : vector<4x18x18xf32> to vector<4x16x16xf32>
    %23 = vector.shape_cast %22 : vector<4x16x16xf32> to vector<64x16xf32>
    %c0_16 = arith.constant 0 : index
    %c0_17 = arith.constant 0 : index
    %c0_18 = arith.constant 0 : index
    %24 = vector.load %arg6[%c0_16, %c0_17, %c0_18] : memref<9x64x1xf32, #tpu.memory_space<vmem>>, vector<1x64x1xf32>
    %25 = vector.shape_cast %24 : vector<1x64x1xf32> to vector<64x1xf32>
    %26 = vector.broadcast %25 : vector<64x1xf32> to vector<64x16xf32>
    %27 = arith.mulf %26, %23 : vector<64x16xf32>
    %28 = arith.addf %21, %27 : vector<64x16xf32>
    %29 = vector.extract_strided_slice %17 {offsets = [0, 0, 1], sizes = [4, 16, 16], strides = [1, 1, 1]} : vector<4x18x18xf32> to vector<4x16x16xf32>
    %30 = vector.shape_cast %29 : vector<4x16x16xf32> to vector<64x16xf32>
    %c1 = arith.constant 1 : index
    %c0_19 = arith.constant 0 : index
    %c0_20 = arith.constant 0 : index
    %31 = vector.load %arg6[%c1, %c0_19, %c0_20] : memref<9x64x1xf32, #tpu.memory_space<vmem>>, vector<1x64x1xf32>
    %32 = vector.shape_cast %31 : vector<1x64x1xf32> to vector<64x1xf32>
    %33 = vector.broadcast %32 : vector<64x1xf32> to vector<64x16xf32>
    %34 = arith.mulf %33, %30 : vector<64x16xf32>
    %35 = arith.addf %28, %34 : vector<64x16xf32>
    %36 = vector.extract_strided_slice %17 {offsets = [0, 0, 2], sizes = [4, 16, 16], strides = [1, 1, 1]} : vector<4x18x18xf32> to vector<4x16x16xf32>
    %37 = vector.shape_cast %36 : vector<4x16x16xf32> to vector<64x16xf32>
    %c2 = arith.constant 2 : index
    %c0_21 = arith.constant 0 : index
    %c0_22 = arith.constant 0 : index
    %38 = vector.load %arg6[%c2, %c0_21, %c0_22] : memref<9x64x1xf32, #tpu.memory_space<vmem>>, vector<1x64x1xf32>
    %39 = vector.shape_cast %38 : vector<1x64x1xf32> to vector<64x1xf32>
    %40 = vector.broadcast %39 : vector<64x1xf32> to vector<64x16xf32>
    %41 = arith.mulf %40, %37 : vector<64x16xf32>
    %42 = arith.addf %35, %41 : vector<64x16xf32>
    %43 = vector.extract_strided_slice %17 {offsets = [0, 1, 0], sizes = [4, 16, 16], strides = [1, 1, 1]} : vector<4x18x18xf32> to vector<4x16x16xf32>
    %44 = vector.shape_cast %43 : vector<4x16x16xf32> to vector<64x16xf32>
    %c3 = arith.constant 3 : index
    %c0_23 = arith.constant 0 : index
    %c0_24 = arith.constant 0 : index
    %45 = vector.load %arg6[%c3, %c0_23, %c0_24] : memref<9x64x1xf32, #tpu.memory_space<vmem>>, vector<1x64x1xf32>
    %46 = vector.shape_cast %45 : vector<1x64x1xf32> to vector<64x1xf32>
    %47 = vector.broadcast %46 : vector<64x1xf32> to vector<64x16xf32>
    %48 = arith.mulf %47, %44 : vector<64x16xf32>
    %49 = arith.addf %42, %48 : vector<64x16xf32>
    %50 = vector.extract_strided_slice %17 {offsets = [0, 1, 1], sizes = [4, 16, 16], strides = [1, 1, 1]} : vector<4x18x18xf32> to vector<4x16x16xf32>
    %51 = vector.shape_cast %50 : vector<4x16x16xf32> to vector<64x16xf32>
    %c4 = arith.constant 4 : index
    %c0_25 = arith.constant 0 : index
    %c0_26 = arith.constant 0 : index
    %52 = vector.load %arg6[%c4, %c0_25, %c0_26] : memref<9x64x1xf32, #tpu.memory_space<vmem>>, vector<1x64x1xf32>
    %53 = vector.shape_cast %52 : vector<1x64x1xf32> to vector<64x1xf32>
    %54 = vector.broadcast %53 : vector<64x1xf32> to vector<64x16xf32>
    %55 = arith.mulf %54, %51 : vector<64x16xf32>
    %56 = arith.addf %49, %55 : vector<64x16xf32>
    %57 = vector.extract_strided_slice %17 {offsets = [0, 1, 2], sizes = [4, 16, 16], strides = [1, 1, 1]} : vector<4x18x18xf32> to vector<4x16x16xf32>
    %58 = vector.shape_cast %57 : vector<4x16x16xf32> to vector<64x16xf32>
    %c5 = arith.constant 5 : index
    %c0_27 = arith.constant 0 : index
    %c0_28 = arith.constant 0 : index
    %59 = vector.load %arg6[%c5, %c0_27, %c0_28] : memref<9x64x1xf32, #tpu.memory_space<vmem>>, vector<1x64x1xf32>
    %60 = vector.shape_cast %59 : vector<1x64x1xf32> to vector<64x1xf32>
    %61 = vector.broadcast %60 : vector<64x1xf32> to vector<64x16xf32>
    %62 = arith.mulf %61, %58 : vector<64x16xf32>
    %63 = arith.addf %56, %62 : vector<64x16xf32>
    %64 = vector.extract_strided_slice %17 {offsets = [0, 2, 0], sizes = [4, 16, 16], strides = [1, 1, 1]} : vector<4x18x18xf32> to vector<4x16x16xf32>
    %65 = vector.shape_cast %64 : vector<4x16x16xf32> to vector<64x16xf32>
    %c6 = arith.constant 6 : index
    %c0_29 = arith.constant 0 : index
    %c0_30 = arith.constant 0 : index
    %66 = vector.load %arg6[%c6, %c0_29, %c0_30] : memref<9x64x1xf32, #tpu.memory_space<vmem>>, vector<1x64x1xf32>
    %67 = vector.shape_cast %66 : vector<1x64x1xf32> to vector<64x1xf32>
    %68 = vector.broadcast %67 : vector<64x1xf32> to vector<64x16xf32>
    %69 = arith.mulf %68, %65 : vector<64x16xf32>
    %70 = arith.addf %63, %69 : vector<64x16xf32>
    %71 = vector.extract_strided_slice %17 {offsets = [0, 2, 1], sizes = [4, 16, 16], strides = [1, 1, 1]} : vector<4x18x18xf32> to vector<4x16x16xf32>
    %72 = vector.shape_cast %71 : vector<4x16x16xf32> to vector<64x16xf32>
    %c7 = arith.constant 7 : index
    %c0_31 = arith.constant 0 : index
    %c0_32 = arith.constant 0 : index
    %73 = vector.load %arg6[%c7, %c0_31, %c0_32] : memref<9x64x1xf32, #tpu.memory_space<vmem>>, vector<1x64x1xf32>
    %74 = vector.shape_cast %73 : vector<1x64x1xf32> to vector<64x1xf32>
    %75 = vector.broadcast %74 : vector<64x1xf32> to vector<64x16xf32>
    %76 = arith.mulf %75, %72 : vector<64x16xf32>
    %77 = arith.addf %70, %76 : vector<64x16xf32>
    %78 = vector.extract_strided_slice %17 {offsets = [0, 2, 2], sizes = [4, 16, 16], strides = [1, 1, 1]} : vector<4x18x18xf32> to vector<4x16x16xf32>
    %79 = vector.shape_cast %78 : vector<4x16x16xf32> to vector<64x16xf32>
    %c8 = arith.constant 8 : index
    %c0_33 = arith.constant 0 : index
    %c0_34 = arith.constant 0 : index
    %80 = vector.load %arg6[%c8, %c0_33, %c0_34] : memref<9x64x1xf32, #tpu.memory_space<vmem>>, vector<1x64x1xf32>
    %81 = vector.shape_cast %80 : vector<1x64x1xf32> to vector<64x1xf32>
    %82 = vector.broadcast %81 : vector<64x1xf32> to vector<64x16xf32>
    %83 = arith.mulf %82, %79 : vector<64x16xf32>
    %84 = arith.addf %77, %83 : vector<64x16xf32>
    %cst_35 = arith.constant 5.000000e-01 : f32
    %85 = vector.broadcast %cst_35 : f32 to vector<64x16xf32>
    %86 = arith.mulf %85, %84 : vector<64x16xf32>
    %cst_36 = arith.constant 0.707106769 : f32
    %87 = vector.broadcast %cst_36 : f32 to vector<64x16xf32>
    %88 = arith.mulf %84, %87 : vector<64x16xf32>
    %89 = math.erf %88 : vector<64x16xf32>
    %cst_37 = arith.constant 1.000000e+00 : f32
    %90 = vector.broadcast %cst_37 : f32 to vector<64x16xf32>
    %91 = arith.addf %90, %89 : vector<64x16xf32>
    %92 = arith.mulf %86, %91 : vector<64x16xf32>
    %c0_38 = arith.constant 0 : index
    %c0_39 = arith.constant 0 : index
    %c0_40 = arith.constant 0 : index
    %93 = vector.load %arg8[%c0_38, %c0_39, %c0_40] : memref<1x64x16xf32, #tpu.memory_space<vmem>>, vector<1x64x16xf32>
    %94 = vector.shape_cast %93 : vector<1x64x16xf32> to vector<64x16xf32>
    %95 = vector.shape_cast %92 : vector<64x16xf32> to vector<1x64x16xf32>
    tpu.vector_store %arg8[%c0_38, %c0_39, %c0_40], %95 {strides = array<i32>} : memref<1x64x16xf32, #tpu.memory_space<vmem>>, vector<1x64x16xf32>,
    return
  }
  func.func @transform_0(%arg0: i32) -> (i32, i32, i32) {
    %c0_i32 = arith.constant 0 : i32
    %c0_i32_0 = arith.constant 0 : i32
    %c0_i32_1 = arith.constant 0 : i32
    return %arg0, %c0_i32, %c0_i32_0 : i32, i32, i32
  }
  func.func @transform_1(%arg0: i32) -> (i32, i32) {
    %c0_i32 = arith.constant 0 : i32
    %c0_i32_0 = arith.constant 0 : i32
    %c0_i32_1 = arith.constant 0 : i32
    return %c0_i32, %c0_i32_0 : i32, i32
  }
  func.func @transform_2(%arg0: i32) -> (i32, i32) {
    %c0_i32 = arith.constant 0 : i32
    %c0_i32_0 = arith.constant 0 : i32
    %c0_i32_1 = arith.constant 0 : i32
    return %c0_i32, %c0_i32_0 : i32, i32
  }
  func.func @transform_3(%arg0: i32) -> (i32, i32) {
    %c0_i32 = arith.constant 0 : i32
    %c0_i32_0 = arith.constant 0 : i32
    %c0_i32_1 = arith.constant 0 : i32
    return %c0_i32, %c0_i32_0 : i32, i32
  }
  func.func @transform_4(%arg0: i32) -> (i32, i32) {
    %c0_i32 = arith.constant 0 : i32
    %c0_i32_0 = arith.constant 0 : i32
    %c0_i32_1 = arith.constant 0 : i32
    return %c0_i32, %c0_i32_0 : i32, i32
  }
  func.func @transform_5(%arg0: i32) -> (i32, i32, i32) {
    %c0_i32 = arith.constant 0 : i32
    %c0_i32_0 = arith.constant 0 : i32
    %c0_i32_1 = arith.constant 0 : i32
    %c0_i32_2 = arith.constant 0 : i32
    return %c0_i32, %c0_i32_0, %c0_i32_1 : i32, i32, i32
  }
  func.func @transform_6(%arg0: i32) -> (i32, i32) {
    %c0_i32 = arith.constant 0 : i32
    %c0_i32_0 = arith.constant 0 : i32
    %c0_i32_1 = arith.constant 0 : i32
    return %c0_i32, %c0_i32_0 : i32, i32
  }
  func.func @transform_7(%arg0: i32) -> (i32, i32, i32) {
    %c0_i32 = arith.constant 0 : i32
    %c0_i32_0 = arith.constant 0 : i32
    %c0_i32_1 = arith.constant 0 : i32
    return %arg0, %c0_i32, %c0_i32_0 : i32, i32, i32
  }
}

</mosaic_0001>

<bundles_post_ra>
// kernel: shuffle_plug_7_forward.1
= control target key start
LH: loop header
LB: loop body
LE: loop exit
PB: predicated region body
PF: predicated region fallthrough
CT: control target
= control target key end

     0   :  { %12 = vsyncpa [#allocation3], 0  ;;  %s3355_s0 = inlined_call_operand.vmem [shape: f32[2,64,16], index: 0, kind: input, shape index: {}]   ;;  %s3356_s1 = inlined_call_operand.vmem [shape: f32[16,16], index: 1, kind: input, shape index: {}]   ;;  %s3357_s2 = inlined_call_operand.vmem [shape: f32[64,64], index: 2, kind: input, shape index: {}]   ;;  %s3358_s3 = inlined_call_operand.vmem [shape: f32[64,1], index: 3, kind: input, shape index: {}]   ;;  %s3359_s4 = inlined_call_operand.vmem [shape: f32[64,1], index: 4, kind: input, shape index: {}]   ;;  %s3360_s5 = inlined_call_operand.vmem [shape: f32[9,64,1], index: 5, kind: input, shape index: {}]   ;;  %s3361_s6 = inlined_call_operand.vmem [shape: f32[64,1], index: 6, kind: input, shape index: {}]   ;;  %s3362_s7 = inlined_call_operand.hbm [shape: f32[2,64,16], index: 7, kind: output, shape index: {}]  }
   0x1   :  { %14 = vsyncpa [#allocation3 + $0x1], 0  ;;  %s2260_s24 = smov 0   ;;  %s2262_s25 = smov 0  }
   0x2   :  { %s2264_s26 = smov 0   ;;  %s2266_s27 = smov 0  }
   0x3 LB: > { %s2281_s28 = sadd.s32 4294967295, %s2212_s27   ;;  %s1974_s29 = sadd.s32 4294967294, %s2212_s27   ;;  %s2212_s27 = sphi %s2266_s27, %s3392_s27   ;;  %s2208_s26 = sphi %s2264_s26, %s3391_s26   ;;  %s2204_s25 = sphi %s2262_s25, %s3390_s25   ;;  %s2200_s24 = sphi %s2260_s24, %s3389_s24  }
   0x4   : > { %s2285_s30 = sadd.s32 1, %s2212_s27   ;;  %s179_s8 = sadd.s32 1, %s2208_s26 }
   0x5   : > { %s176_s9 = ssub.s32 %s2212_s27, %s2285_s30  ;;  %p189_p0 = scmp.ne.s32.totalorder %s2208_s26, %s2204_s25 }
   0x6   : > { %p177_p1 = scmp.eq.s32.totalorder %s176_s9, 0  ;;  %p190_p2 = scmp.eq.s32.totalorder %s2281_s28, 1 }
   0x7   : > { %p195_p3 = scmp.ne.s32.totalorder %s2204_s25, %s2200_s24  ;;  %p196_p4 = scmp.eq.s32.totalorder %s1974_s29, 1 }
   0x8   : > { %s2296_s10 = scalar_select %p177_p1, %s2208_s26, %s179_s8  }
   0x9   : > { %p2298_p5 = por %p190_p2, %p189_p0  ;;  %p2302_p6 = por %p196_p4, %p195_p3 }
   0xa   : > { %p1977_p7 = scmp.ge.s32.totalorder %s2212_s27, 1  ;;  %p240_p8 = scmp.lt.s32.totalorder %s2212_s27, 3 }
   0xc   : > { %p241_p9 = pnand %p1977_p7, %p240_p8 }
   0xe   : > { %244 = sbr.rel (%p241_p9) target bundleno = 757 (0x2f5), region = 48 }
  0x13   : > { %v431_v0 = vld [vmem:[%s3358_s3 + $0x20] sm:$0xff]  ;;  %v429_v1 = vld [vmem:[%s3358_s3 + $0x10] sm:$0xff]  ;;  %p272_p10 = scmp.lt.s32.totalorder %s2281_s28, 1  ;;  %v2214_v3 = vmov 0   ;;  %v286_v4 = vld [vmem:[%s3356_s1 + $0x8] sm:$0xff]  ;;  %vm287_vm0 = vcmask 130048  }
  0x14   : > { %v427_v2 = vld [vmem:[%s3358_s3] sm:$0xff]  ;;  %2133 = vset.pattern.permute.xlu2 %v2214_v3  ;;  %2132 = vset.pattern.permute.xlu1 %v2214_v3  ;;  %v432_v10 = vld [vmem:[%s3358_s3 + $0x28] sm:$0xff]  ;;  %v430_v11 = vld [vmem:[%s3358_s3 + $0x18] sm:$0xff]  ;;  %vm361_vm1 = vcmask 523264   ;;  %s2215_s9 = smov 1   ;;  %vm579_vm2 = vcmask 7168  }
  0x15   : > { %2131 = vset.pattern.permute.xlu0 %v2214_v3  ;;  %457 = vperm.xlu2 %2133, %v431_v0   ;;  %s273_s21 = scalar_select %p272_p10, %s2281_s28, 1  ;;  %v285_v5 = vld [vmem:[%s3356_s1] sm:$0xff]  ;;  %v428_v12 = vld [vmem:[%s3358_s3 + $0x8] sm:$0xff]  ;;  %v434_v18 = vld [vmem:[%s3358_s3 + $0x38] sm:$0xff]  ;;  %vm588_vm3 = vcmask 138240   ;;  %vm605_vm4 = vcmask 1040384  }
  0x16   : > { %447 = vperm.xlu1 %2132, %v429_v1   ;;  %437 = vperm.xlu0 %2131, %v427_v2   ;;  %v491_v17 = vld [vmem:[%s3359_s4] sm:$0xff]  ;;  %v433_v19 = vld [vmem:[%s3358_s3 + $0x30] sm:$0xff]  ;;  %v494_v22 = vld [vmem:[%s3359_s4 + $0x18] sm:$0xff]  ;;  %vm960_vm5 = vcmask 1046528   ;;  %vm1248_vm6 = vcmask 1045504   ;;  %s2216_s8 = smov 127  }
  0x17   : > { %326 = vmatpush.msra.mxu0 %v286_v4  ;;  %2076 = vmatpush.msra.mxu3 %v286_v4  ;;  %s2074_s29 = sshll.u32 %s273_s21, 6  ;;  %v353_v20 = vld [vmem:[%s3357_s2] sm:$0xff]  ;;  %v493_v23 = vld [vmem:[%s3359_s4 + $0x10] sm:$0xff]  ;;  %v492_v24 = vld [vmem:[%s3359_s4 + $0x8] sm:$0xff]  ;;  %s2075_s16 = sshll.u32 %s2281_s28, 6 }
  0x18   : > { %s276_s13 = scalar_lea.vmem %s3355_s0, %s2074_s29  ;;  %v357_v21 = vld [vmem:[%s3357_s2 + $0x20] sm:$0xff]  ;;  %v354_v25 = vld [vmem:[%s3357_s2 + $0x8] sm:$0xff]  ;;  %v497_v27 = vld [vmem:[%s3359_s4 + $0x30] sm:$0xff]  ;;  %s1908_s19 = scalar_lea.hbm %s3362_s7, %s2075_s16 }
  0x19   : > { %327 = vmatpush.msra.mxu0 %v285_v5  ;;  %2077 = vmatpush.msra.mxu3 %v285_v5  ;;  %v277_v6 = vld [vmem:[%s276_s13] sm:$0xff]  ;;  %v282_v7 = vld [vmem:[%s276_s13 + $0x28] sm:$0xff]  ;;  %v284_v8 = vld [vmem:[%s276_s13 + $0x38] sm:$0xff]  ;;  %s1911_s21 = sshll.u32 %s1908_s19, 4  ;;  %s2170_s14 = scalar_lea.hbm %s3362_s7, 128  ;;  %s1912_s21 = int_to_ptr.hbm [resolvable:$true] %s1911_s21 }
  0x1a   : > { %1981 = vmatmul.msk.f32.vlgmr.msra.gmra.mxu0 %vm287_vm0, %v277_v6  ;;  %1986 = vmatmul.msk.f32.vlgmr.msra.gmra.mxu3 %vm287_vm0, %v282_v7  ;;  %v283_v9 = vld [vmem:[%s276_s13 + $0x30] sm:$0xff]  ;;  %v281_v13 = vld [vmem:[%s276_s13 + $0x20] sm:$0xff]  ;;  %v278_v14 = vld [vmem:[%s276_s13 + $0x8] sm:$0xff]  ;;  %s2164_s22 = sshra.s32 %s1912_s21, 4  ;;  %s2165_s22 = int_to_ptr.hbm [resolvable:$true] %s2164_s22 }
  0x1b   : > { %394 = vmatpush.msra.mxu1 %v284_v8  ;;  %2078 = vmatpush.msra.mxu2 %v284_v8  ;;  %v280_v15 = vld [vmem:[%s276_s13 + $0x18] sm:$0xff]  ;;  %v279_v16 = vld [vmem:[%s276_s13 + $0x10] sm:$0xff]  ;;  %v358_v26 = vld [vmem:[%s3357_s2 + $0x28] sm:$0xff]  ;;  %s2217_s13 = smov 126   ;;  %s2166_s23 = scalar_lea.hbm %s2165_s22, 64 }
  0x1c   : > { %v496_v28 = vld [vmem:[%s3359_s4 + $0x28] sm:$0xff]  ;;  %v495_v29 = vld [vmem:[%s3359_s4 + $0x20] sm:$0xff]  ;;  %v355_v30 = vld [vmem:[%s3357_s2 + $0x10] sm:$0xff]  ;;  %p2167_p11 = scmp.ne.s32.totalorder %s2165_s22, %s2166_s23  ;;  %p2171_p0 = scmp.lt.s32.totalorder %s2165_s22, %s3362_s7 }
  0x1d   : > { %395 = vmatpush.msra.mxu1 %v283_v9  ;;  %2079 = vmatpush.msra.mxu2 %v283_v9  ;;  %v359_v31 = vld [vmem:[%s3357_s2 + $0x30] sm:$0xff]  ;;  %v639_v33 = vld [vmem:[%s3361_s6 + $0x8] sm:$0xff]  ;;  %v498_v34 = vld [vmem:[%s3359_s4 + $0x38] sm:$0xff]  ;;  %p2172_p1 = scmp.lt.s32.totalorder %s2170_s14, %s2166_s23 }
  0x1e   : > { %462 = vperm.xlu2 %2133, %v432_v10   ;;  %452 = vperm.xlu1 %2132, %v430_v11   ;;  %v640_v32 = vld [vmem:[%s3361_s6 + $0x10] sm:$0xff]  ;;  %v356_v35 = vld [vmem:[%s3357_s2 + $0x18] sm:$0xff]  ;;  %v643_v37 = vld [vmem:[%s3361_s6 + $0x28] sm:$0xff]  ;;  %p2168_p12 = pnand %p2167_p11, %p2298_p5 }
  0x1f   : > { %442 = vperm.xlu0 %2131, %v428_v12   ;;  %396 = vmatpush.msra.mxu1 %v282_v7  ;;  %v360_v36 = vld [vmem:[%s3357_s2 + $0x38] sm:$0xff]  ;;  %v642_v38 = vld [vmem:[%s3361_s6 + $0x20] sm:$0xff]  ;;  %v696_v44 = vld [vmem:[%s3360_s5 + $0x10] sm:$0xff]  ;;  %p2173_p2 = por %p2172_p1, %p2171_p0 }
  0x20   : > { %2080 = vmatpush.msra.mxu2 %v282_v7  ;;  %v638_v39 = vld [vmem:[%s3361_s6] sm:$0xff]  ;;  %v645_v41 = vld [vmem:[%s3361_s6 + $0x38] sm:$0xff]  ;;  %v644_v45 = vld [vmem:[%s3361_s6 + $0x30] sm:$0xff]  ;;  %p2169_p13 = pneg %p2168_p12 }
  0x21   : > { %397 = vmatpush.msra.mxu1 %v281_v13  ;;  %v694_v40 = vld [vmem:[%s3360_s5] sm:$0xff]  ;;  %v641_v42 = vld [vmem:[%s3361_s6 + $0x18] sm:$0xff]  ;;  %v700_v46 = vld [vmem:[%s3360_s5 + $0x30] sm:$0xff] }
  0x22   : > { %2081 = vmatpush.msra.mxu2 %v281_v13  ;;  %1982 = vmatmul.msk.f32.gmra.mxu0 %vm287_vm0, %v278_v14  ;;  %v697_v43 = vld [vmem:[%s3360_s5 + $0x18] sm:$0xff]  ;;  %v699_v47 = vld [vmem:[%s3360_s5 + $0x28] sm:$0xff]  ;;  %v1997_v50 = vld [vmem:[%s3360_s5 + $0x40] sm:$0xff]  ;;  %p2174_p3 = pnand %p2173_p2, %p2169_p13 }
  0x23   : > { %1987 = vmatmul.msk.f32.gmra.mxu3 %vm287_vm0, %v283_v9  ;;  %398 = vmatpush.msra.mxu1 %v280_v15  ;;  %v695_v48 = vld [vmem:[%s3360_s5 + $0x8] sm:$0xff]  ;;  %v698_v51 = vld [vmem:[%s3360_s5 + $0x20] sm:$0xff]  ;;  %v2000_v53 = vld [vmem:[%s3360_s5 + $0x58] sm:$0xff] }
  0x24   : > { %2082 = vmatpush.msra.mxu2 %v280_v15  ;;  %v1998_v49 = vld [vmem:[%s3360_s5 + $0x48] sm:$0xff]  ;;  %v2001_v52 = vld [vmem:[%s3360_s5 + $0x60] sm:$0xff]  ;;  %v701_v54 = vld [vmem:[%s3360_s5 + $0x38] sm:$0xff] }
  0x25   : > { %399 = vmatpush.msra.mxu1 %v279_v16  ;;  %v2004_v56 = vld [vmem:[%s3360_s5 + $0x78] sm:$0xff]  ;;  %v2003_v57 = vld [vmem:[%s3360_s5 + $0x70] sm:$0xff]  ;;  %v2005_v60 = vld [vmem:[%s3360_s5 + $0x80] sm:$0xff] }
  0x26   : > { %2083 = vmatpush.msra.mxu2 %v279_v16  ;;  %501 = vperm.xlu2 %2133, %v491_v17   ;;  %v1999_v58 = vld [vmem:[%s3360_s5 + $0x50] sm:$0xff]  ;;  %v2002_v62 = vld [vmem:[%s3360_s5 + $0x68] sm:$0xff]  ;;  %v2008_v0 = vld [vmem:[%s3360_s5 + $0x98] sm:$0xff] }
  0x27   : > { %472 = vperm.xlu1 %2132, %v434_v18   ;;  %467 = vperm.xlu0 %2131, %v433_v19   ;;  %v2007_v61 = vld [vmem:[%s3360_s5 + $0x90] sm:$0xff]  ;;  %v2010_v1 = vld [vmem:[%s3360_s5 + $0xa8] sm:$0xff] }
  0x28   : > { %400 = vmatpush.msra.mxu1 %v278_v14  ;;  %2084 = vmatpush.msra.mxu2 %v278_v14  ;;  %v2006_v2 = vld [vmem:[%s3360_s5 + $0x88] sm:$0xff]  ;;  %v2015_v12 = vld [vmem:[%s3360_s5 + $0xd0] sm:$0xff]  ;;  %v2012_v14 = vld [vmem:[%s3360_s5 + $0xb8] sm:$0xff] }
  0x29   : > { %v2014_v7 = vld [vmem:[%s3360_s5 + $0xc8] sm:$0xff] }
  0x2a   : > { %401 = vmatpush.msra.mxu1 %v277_v6  ;;  %2085 = vmatpush.msra.mxu2 %v277_v6  ;;  %v2011_v6 = vld [vmem:[%s3360_s5 + $0xb0] sm:$0xff]  ;;  %v2018_v19 = vld [vmem:[%s3360_s5 + $0xe8] sm:$0xff] }
  0x2b   : > { %1989 = vmatmul.msk.f32.vlgmr.msra.gmra.mxu1 %vm361_vm1, %v353_v20  ;;  %1993 = vmatmul.msk.f32.vlgmr.msra.gmra.mxu2 %vm361_vm1, %v357_v21  ;;  %v2020_v20 = vld [vmem:[%s3360_s5 + $0xf8] sm:$0xff]  ;;  %v2013_v21 = vld [vmem:[%s3360_s5 + $0xc0] sm:$0xff] }
  0x2c   : > { %1983 = vmatmul.msk.f32.gmra.mxu0 %vm287_vm0, %v279_v16  ;;  %1988 = vmatmul.msk.f32.gmra.mxu3 %vm287_vm0, %v284_v8  ;;  %v2009_v8 = vld [vmem:[%s3360_s5 + $0xa0] sm:$0xff] }
  0x2e   : > { %516 = vperm.xlu2 %2133, %v494_v22  }
  0x2f   : > { %511 = vperm.xlu1 %2132, %v493_v23   ;;  %506 = vperm.xlu0 %2131, %v492_v24  }
  0x33   : > { %1990 = vmatmul.msk.f32.gmra.mxu1 %vm361_vm1, %v354_v25  ;;  %1994 = vmatmul.msk.f32.gmra.mxu2 %vm361_vm1, %v358_v26  ;;  %v2021_v26 = vld [vmem:[%s3360_s5 + $0x100] sm:$0xff] }
  0x34   : > { %1984 = vmatmul.msk.f32.gmra.mxu0 %vm287_vm0, %v280_v15 }
  0x36   : > { %531 = vperm.xlu2 %2133, %v497_v27   ;;  %v2016_v27 = vld [vmem:[%s3360_s5 + $0xd8] sm:$0xff] }
  0x37   : > { %526 = vperm.xlu1 %2132, %v496_v28   ;;  %521 = vperm.xlu0 %2131, %v495_v29  }
  0x3b   : > { %1991 = vmatmul.msk.f32.gmra.mxu1 %vm361_vm1, %v355_v30  ;;  %1995 = vmatmul.msk.f32.gmra.mxu2 %vm361_vm1, %v359_v31 }
  0x3c   : > { %1985 = vmatmul.msk.f32.gmra.mxu0 %vm287_vm0, %v281_v13  ;;  %v2017_v13 = vld [vmem:[%s3360_s5 + $0xe0] sm:$0xff] }
  0x3e   : > { %658 = vperm.xlu2 %2133, %v640_v32  }
  0x3f   : > { %653 = vperm.xlu1 %2132, %v639_v33   ;;  %536 = vperm.xlu0 %2131, %v498_v34  }
  0x43   : > { %1992 = vmatmul.msk.f32.gmra.mxu1 %vm361_vm1, %v356_v35  ;;  %1996 = vmatmul.msk.f32.gmra.mxu2 %vm361_vm1, %v360_v36  ;;  %v2019_v36 = vld [vmem:[%s3360_s5 + $0xf0] sm:$0xff] }
  0x46   : > { %673 = vperm.xlu2 %2133, %v643_v37  }
  0x47   : > { %668 = vperm.xlu1 %2132, %v642_v38   ;;  %648 = vperm.xlu0 %2131, %v638_v39  }
  0x4e   : > { %704 = vperm.xlu2 %2133, %v694_v40  }
  0x4f   : > { %683 = vperm.xlu1 %2132, %v645_v41   ;;  %663 = vperm.xlu0 %2131, %v641_v42  }
  0x56   : > { %719 = vperm.xlu2 %2133, %v697_v43  }
  0x57   : > { %714 = vperm.xlu1 %2132, %v696_v44   ;;  %678 = vperm.xlu0 %2131, %v644_v45  }
  0x5e   : > { %734 = vperm.xlu2 %2133, %v700_v46   ;;  %v2023_v46 = vld [vmem:[%s3360_s5 + $0x110] sm:$0xff] }
  0x5f   : > { %729 = vperm.xlu1 %2132, %v699_v47   ;;  %709 = vperm.xlu0 %2131, %v695_v48  }
  0x66   : > { %774 = vperm.xlu2 %2133, %v1998_v49  }
  0x67   : > { %769 = vperm.xlu1 %2132, %v1997_v50   ;;  %724 = vperm.xlu0 %2131, %v698_v51  }
  0x6e   : > { %789 = vperm.xlu2 %2133, %v2001_v52  }
  0x6f   : > { %784 = vperm.xlu1 %2132, %v2000_v53   ;;  %739 = vperm.xlu0 %2131, %v701_v54   ;;  %v2467_v55 = vpop.permute.xlu2 %457 }
  0x76   : > { %804 = vperm.xlu2 %2133, %v2004_v56  }
  0x77   : > { %799 = vperm.xlu1 %2132, %v2003_v57   ;;  %779 = vperm.xlu0 %2131, %v1999_v58  }
  0x78   : > { %v2478_v59 = vpop.permute.xlu2 %462 }
  0x7e   : > { %866 = vperm.xlu2 %2133, %v2005_v60   ;;  %v2026_v60 = vld [vmem:[%s3360_s5 + $0x128] sm:$0xff] }
  0x7f   : > { %876 = vperm.xlu1 %2132, %v2007_v61   ;;  %794 = vperm.xlu0 %2131, %v2002_v62  }
  0x80   : > { %v502_v63 = vpop.permute.xlu2 %501 }
  0x86   : > { %881 = vperm.xlu2 %2133, %v2008_v0  }
  0x87   : > { %891 = vperm.xlu1 %2132, %v2010_v1   ;;  %871 = vperm.xlu0 %2131, %v2006_v2  }
  0x88   : > { %v2498_v3 = vpop.permute.xlu2 %516  ;;  %v2500_v4 = vpop.permute.xlu1 %447 }
  0x89   : > { %v438_v5 = vpop.permute.xlu0 %437 }
  0x8e   : > { %896 = vperm.xlu2 %2133, %v2011_v6  }
  0x8f   : > { %1005 = vperm.xlu1 %2132, %v2014_v7   ;;  %886 = vperm.xlu0 %2131, %v2009_v8  }
  0x90   : > { %v2511_v9 = vpop.permute.xlu2 %531  ;;  %v2513_v10 = vpop.permute.xlu1 %452 }
  0x91   : > { %v443_v11 = vpop.permute.xlu0 %442 }
  0x96   : > { %1010 = vperm.xlu2 %2133, %v2015_v12  }
  0x97   : > { %1020 = vperm.xlu1 %2132, %v2017_v13   ;;  %901 = vperm.xlu0 %2131, %v2012_v14   ;;  %v329_v15 = vpop.f32.mrf.mxu0 }
  0x98   : > { %v2524_v16 = vpop.permute.xlu2 %658  ;;  %v475_v28 = vmul.f32 %v438_v5, %v329_v15 }
  0x99   : > { %v2526_v17 = vpop.permute.xlu1 %472  ;;  %v468_v18 = vpop.permute.xlu0 %467 }
  0x9d   : > { %v344_v37 = vpop.f32.mrf.mxu3 }
  0x9e   : > { %1025 = vperm.xlu2 %2133, %v2018_v19   ;;  %v480_v48 = vmul.f32 %v2478_v59, %v344_v37  ;;  %v2024_v59 = vld [vmem:[%s3360_s5 + $0x118] sm:$0xff] }
  0x9f   : > { %1035 = vperm.xlu1 %2132, %v2020_v20   ;;  %1000 = vperm.xlu0 %2131, %v2013_v21   ;;  %v332_v23 = vpop.f32.mrf.mxu0 }
  0xa0   : > { %v2537_v22 = vpop.permute.xlu2 %673  ;;  %v476_v39 = vmul.f32 %v443_v11, %v332_v23 }
  0xa1   : > { %v512_v24 = vpop.permute.xlu1 %511  ;;  %v507_v25 = vpop.permute.xlu0 %506 }
  0xa6   : > { %1065 = vperm.xlu2 %2133, %v2021_v26   ;;  %v347_v51 = vpop.f32.mrf.mxu3  ;;  %v2025_v26 = vld [vmem:[%s3360_s5 + $0x120] sm:$0xff] }
  0xa7   : > { %1015 = vperm.xlu0 %2131, %v2016_v27  }
  0xa8   : > { %v403_v29 = vpop.f32.mrf.mxu1  ;;  %v2545_v30 = vpop.permute.xlu2 %704 }
  0xa9   : > { %v483_v31 = vadd.f32 %v475_v28, %v403_v29  ;;  %v527_v32 = vpop.permute.xlu1 %526  ;;  %v522_v33 = vpop.permute.xlu0 %521  ;;  %v2027_v29 = vld [vmem:[%s3360_s5 + $0x130] sm:$0xff] }
  0xaa   : > { %v335_v34 = vpop.f32.mrf.mxu0 }
  0xab   : > { %v539_v35 = vadd.f32 %v502_v63, %v483_v31  ;;  %v477_v61 = vmul.f32 %v2500_v4, %v335_v34  ;;  %v481_v63 = vmul.f32 %v468_v18, %v347_v51  ;;  %v2035_v51 = vld [vmem:[%s3360_s5 + $0x170] sm:$0xff] }
  0xad   : > { %555 = vrot.lane.b32.xlu1 %v539_v35, %s2215_s9  ;;  %v2033_v35 = vld [vmem:[%s3360_s5 + $0x160] sm:$0xff] }
  0xae   : > { %v415_v38 = vpop.f32.mrf.mxu2 }
  0xaf   : > { %1030 = vperm.xlu0 %2131, %v2019_v36   ;;  %v350_v12 = vpop.f32.mrf.mxu3  ;;  %v2031_v36 = vld [vmem:[%s3360_s5 + $0x150] sm:$0xff] }
  0xb0   : > { %v406_v40 = vpop.f32.mrf.mxu1  ;;  %v2551_v41 = vpop.permute.xlu2 %719  ;;  %v482_v14 = vmul.f32 %v2526_v17, %v350_v12 }
  0xb1   : > { %3369 = vst [vmem:[#allocation5_spill] sm:$0xff] %v2551_v41  ;;  %v484_v42 = vadd.f32 %v476_v39, %v406_v40  ;;  %v2553_v43 = vpop.permute.xlu1 %653  ;;  %v537_v44 = vpop.permute.xlu0 %536 }
  0xb2   : > { %v338_v45 = vpop.f32.mrf.mxu0 }
  0xb3   : > { %v540_v47 = vadd.f32 %v507_v25, %v484_v42  ;;  %v478_v15 = vmul.f32 %v2513_v10, %v338_v45  ;;  %v2036_v42 = vld [vmem:[%s3360_s5 + $0x178] sm:$0xff] }
  0xb5   : > { %1075 = vperm.xlu1 %2132, %v2023_v46   ;;  %557 = vrot.lane.b32.xlu2 %v540_v47, %s2215_s9  ;;  %v2032_v46 = vld [vmem:[%s3360_s5 + $0x158] sm:$0xff] }
  0xb6   : > { %v418_v49 = vpop.f32.mrf.mxu2 }
  0xb7   : > { %v488_v50 = vadd.f32 %v480_v48, %v418_v49  ;;  %v2037_v49 = vld [vmem:[%s3360_s5 + $0x180] sm:$0xff] }
  0xb8   : > { %v2560_v52 = vpop.permute.xlu2 %734  ;;  %v409_v57 = vpop.f32.mrf.mxu1 }
  0xb9   : > { %v544_v53 = vadd.f32 %v527_v32, %v488_v50  ;;  %v2562_v54 = vpop.permute.xlu1 %668  ;;  %v2564_v56 = vpop.permute.xlu0 %648  ;;  %v485_v0 = vadd.f32 %v477_v61, %v409_v57  ;;  %v2028_v32 = vld [vmem:[%s3360_s5 + $0x138] sm:$0xff]  ;;  %v2038_v50 = vld [vmem:[%s3360_s5 + $0x188] sm:$0xff]  ;;  %v2039_v61 = vld [vmem:[%s3360_s5 + $0x190] sm:$0xff] }
  0xba   : > { %v341_v58 = vpop.f32.mrf.mxu0 }
  0xbb   : > { %v479_v62 = vmul.f32 %v2467_v55, %v341_v58  ;;  %565 = vrot.lane.b32.xlu0 %v544_v53, %s2215_s9  ;;  %v541_v7 = vadd.f32 %v512_v24, %v485_v0  ;;  %v2040_v58 = vld [vmem:[%s3360_s5 + $0x198] sm:$0xff] }
  0xbd   : > { %1090 = vperm.xlu1 %2132, %v2026_v60   ;;  %1080 = vperm.xlu2 %2133, %v2024_v59   ;;  %v487_v2 = vadd.f32 %v479_v62, %v415_v38  ;;  %v2029_v38 = vld [vmem:[%s3360_s5 + $0x140] sm:$0xff] }
  0xbe   : > { %v421_v1 = vpop.f32.mrf.mxu2  ;;  %v2041_v60 = vld [vmem:[%s3360_s5 + $0x1a0] sm:$0xff] }
  0xbf   : > { %v489_v5 = vadd.f32 %v481_v63, %v421_v1  ;;  %v543_v55 = vadd.f32 %v522_v33, %v487_v2 }
  0xc0   : > { %v2575_v6 = vpop.permute.xlu2 %774  ;;  %v412_v13 = vpop.f32.mrf.mxu1 }
  0xc1   : > { %v2577_v8 = vpop.permute.xlu1 %683  ;;  %v2579_v11 = vpop.permute.xlu0 %663  ;;  %v545_v4 = vadd.f32 %v2511_v9, %v489_v5  ;;  %v486_v19 = vadd.f32 %v478_v15, %v412_v13  ;;  %v2022_v9 = vld [vmem:[%s3360_s5 + $0x108] sm:$0xff] }
  0xc2   : > { %3370 = vst [vmem:[#allocation6_spill] sm:$0xff] %v2577_v8 }
  0xc3   : > { %3371 = vst [vmem:[#allocation7_spill] sm:$0xff] %v2579_v11  ;;  %559 = vrot.lane.b32.xlu0 %v541_v7, %s2215_s9  ;;  %v542_v17 = vadd.f32 %v2498_v3, %v486_v19  ;;  %v2030_v3 = vld [vmem:[%s3360_s5 + $0x148] sm:$0xff] }
  0xc5   : > { %567 = vrot.lane.b32.xlu1 %v545_v4, %s2215_s9  ;;  %563 = vrot.lane.b32.xlu2 %v543_v55, %s2215_s9 }
  0xc6   : > { %v424_v18 = vpop.f32.mrf.mxu2 }
  0xc7   : > { %v490_v20 = vadd.f32 %v482_v14, %v424_v18 }
  0xc8   : > { %v2587_v21 = vpop.permute.xlu2 %789 }
  0xc9   : > { %v2592_v23 = vpop.permute.xlu1 %714  ;;  %v2594_v24 = vpop.permute.xlu0 %678  ;;  %v546_v10 = vadd.f32 %v537_v44, %v490_v20  ;;  %v2034_v44 = vld [vmem:[%s3360_s5 + $0x168] sm:$0xff] }
  0xcb   : > { %1070 = vperm.xlu0 %2131, %v2022_v9  }
  0xcd   : > { %561 = vrot.lane.b32.xlu1 %v542_v17, %s2215_s9  ;;  %569 = vrot.lane.b32.xlu2 %v546_v10, %s2215_s9 }
  0xd0   : > { %v2599_v25 = vpop.permute.xlu2 %804 }
  0xd1   : > { %v2604_v27 = vpop.permute.xlu1 %729  ;;  %v2606_v28 = vpop.permute.xlu0 %709 }
  0xd3   : > { %1085 = vperm.xlu0 %2131, %v2025_v26  }
  0xd5   : > { %1167 = vperm.xlu1 %2132, %v2030_v3   ;;  %1095 = vperm.xlu2 %2133, %v2027_v29  }
  0xd8   : > { %v2614_v31 = vpop.permute.xlu2 %866 }
  0xd9   : > { %v2619_v33 = vpop.permute.xlu1 %769  ;;  %v2621_v34 = vpop.permute.xlu0 %724 }
  0xdb   : > { %1100 = vperm.xlu0 %2131, %v2028_v32  }
  0xdd   : > { %1182 = vperm.xlu1 %2132, %v2033_v35   ;;  %1172 = vperm.xlu2 %2133, %v2031_v36  }
  0xe0   : > { %v2629_v37 = vpop.permute.xlu2 %881 }
  0xe1   : > { %v2634_v39 = vpop.permute.xlu1 %784  ;;  %v2636_v40 = vpop.permute.xlu0 %739 }
  0xe2   : > { %3372 = vst [vmem:[#allocation8_spill] sm:$0xff] %v2636_v40 }
  0xe3   : > { %1162 = vperm.xlu0 %2131, %v2029_v38  }
  0xe5   : > { %1197 = vperm.xlu1 %2132, %v2036_v42   ;;  %1187 = vperm.xlu2 %2133, %v2034_v44  }
  0xe8   : > { %v2644_v45 = vpop.permute.xlu2 %896 }
  0xe9   : > { %v2649_v47 = vpop.permute.xlu1 %799  ;;  %v2651_v48 = vpop.permute.xlu0 %779 }
  0xeb   : > { %1177 = vperm.xlu0 %2131, %v2032_v46  }
  0xed   : > { %1288 = vperm.xlu1 %2132, %v2037_v49   ;;  %1293 = vperm.xlu2 %2133, %v2038_v50  }
  0xf0   : > { %v2672_v59 = vpop.permute.xlu2 %1010 }
  0xf1   : > { %v2662_v53 = vpop.permute.xlu1 %876  ;;  %v2664_v57 = vpop.permute.xlu0 %794 }
  0xf3   : > { %1192 = vperm.xlu0 %2131, %v2035_v51  }
  0xf5   : > { %1303 = vperm.xlu1 %2132, %v2040_v58   ;;  %1308 = vperm.xlu2 %2133, %v2041_v60  }
  0xf8   : > { %v2679_v0 = vpop.permute.xlu2 %1025 }
  0xf9   : > { %v2677_v62 = vpop.permute.xlu1 %891  ;;  %v872_v63 = vpop.permute.xlu0 %871 }
  0xfb   : > { %1298 = vperm.xlu0 %2131, %v2039_v61  }
 0x100   : > { %v2683_v5 = vpop.permute.xlu2 %1065 }
 0x101   : > { %v2681_v1 = vpop.permute.xlu0 %886  ;;  %v1006_v2 = vpop.permute.xlu1 %1005 }
 0x109   : > { %v2685_v7 = vpop.permute.xlu0 %901  ;;  %v2687_v12 = vpop.permute.xlu1 %1020 }
 0x10f   : > { %v558_v4 = vpop.permute.xlu2 %557 }
 0x110   : > { %v581_v15 = vsel %vm579_vm2, 0.0, %v558_v4 }
 0x111   : > { %v1001_v55 = vpop.permute.xlu0 %1000  ;;  %v2689_v13 = vpop.permute.xlu1 %1035  ;;  %v590_v19 = vsel %vm588_vm3, %v581_v15, 0.0 }
 0x112   : > { %v607_v20 = vrot.slane %v590_v19, 7 }
 0x114   : > { %v634_v29 = vsel %vm605_vm4, %v607_v20, 0.0 }
 0x115   : > { %v964_v50 = vrot.slane %v634_v29, 1  ;;  %v1252_v58 = vrot.slane %v634_v29, 2 }
 0x117   : > { %v2691_v14 = vpop.permute.xlu2 %1080 }
 0x119   : > { %v2694_v18 = vpop.permute.xlu0 %1015 }
 0x11f   : > { %v556_v9 = vpop.permute.xlu1 %555  ;;  %v564_v17 = vpop.permute.xlu2 %563 }
 0x120   : > { %v580_v10 = vsel %vm579_vm2, 0.0, %v556_v9  ;;  %v584_v36 = vsel %vm579_vm2, 0.0, %v564_v17 }
 0x121   : > { %v589_v26 = vsel %vm588_vm3, %v580_v10, 0.0  ;;  %v2708_v42 = vpop.permute.xlu0 %1030 }
 0x122   : > { %v606_v3 = vrot.slane %v589_v26, 7 }
 0x124   : > { %v2701_v32 = vsel %vm605_vm4, %v606_v3, %v607_v20  ;;  %v2704_v35 = vsel %vm605_vm4, 0.0, %v606_v3 }
 0x125   : > { %v961_v38 = vrot.slane %v2704_v35, 1  ;;  %v807_v44 = vmul.f32 %v2619_v33, %v2704_v35  ;;  %v904_v46 = vmul.f32 %v2614_v31, %v2704_v35  ;;  %v905_v49 = vmul.f32 %v872_v63, %v2701_v32 }
 0x126   : > { %v962_v51 = vrot.slane %v2701_v32, 1  ;;  %v1250_v33 = vrot.slane %v2701_v32, 2  ;;  %v1249_v31 = vrot.slane %v2704_v35, 2  ;;  %v593_v63 = vsel %vm588_vm3, %v584_v36, 0.0 }
 0x127   : > { %v2716_v60 = vpop.permute.xlu1 %1075  ;;  %823 = vrot.lane.b32.xlu0 %v807_v44, %s2216_s8  ;;  %920 = vrot.lane.b32.xlu1 %v904_v46, %s2217_s13  ;;  %v570_v61 = vpop.permute.xlu2 %569  ;;  %v612_v3 = vrot.slane %v593_v63, 7  ;;  %v808_v44 = vmul.f32 %v2575_v6, %v2701_v32 }
 0x128   : > { %922 = vrot.lane.b32.xlu2 %v905_v49, %s2217_s13  ;;  %v587_v4 = vsel %vm579_vm2, 0.0, %v570_v61  ;;  %v2726_v15 = vsel %vm960_vm5, %v961_v38, %v962_v51  ;;  %v2729_v19 = vsel %vm960_vm5, %v962_v51, %v964_v50  ;;  %v2736_v17 = vsel %vm1248_vm6, %v1250_v33, %v1252_v58 }
 0x129   : > { %v596_v20 = vsel %vm588_vm3, %v587_v4, 0.0  ;;  %v2733_v9 = vmul.f32 %v1006_v2, %v2729_v19  ;;  %v2739_v26 = vsel %vm1248_vm6, %v1249_v31, %v1250_v33  ;;  %v2742_v29 = vmul.f32 %v1001_v55, %v2726_v15 }
 0x12a   : > { %v616_v10 = vrot.slane %v596_v20, 7  ;;  %v2751_v46 = vsel %vm605_vm4, 0.0, %v612_v3  ;;  %v1103_v20 = vmul.f32 %v2683_v5, %v2726_v15 }
 0x12b   : > { %v971_v61 = vrot.slane %v2751_v46, 1  ;;  %v1259_v6 = vrot.slane %v2751_v46, 2 }
 0x12c   : > { %v2745_v36 = vsel %vm605_vm4, %v616_v10, 0.0 }
 0x12d   : > { %v566_v38 = vpop.permute.xlu0 %565 }
 0x12e   : > { %v585_v2 = vsel %vm579_vm2, 0.0, %v566_v38 }
 0x12f   : > { %v594_v49 = vsel %vm588_vm3, %v585_v2, 0.0  ;;  %v2754_v50 = vpop.permute.xlu1 %1090  ;;  %825 = vrot.lane.b32.xlu1 %v808_v44, %s2216_s8 }
 0x130   : > { %v613_v55 = vrot.slane %v594_v49, 7 }
 0x132   : > { %v2758_v51 = vsel %vm605_vm4, %v612_v3, %v613_v55  ;;  %v636_v58 = vsel %vm605_vm4, %v613_v55, 0.0  ;;  %v2779_v55 = vpop.permute.xlu2 %1095 }
 0x133   : > { %v974_v33 = vrot.slane %v636_v58, 1  ;;  %v1262_v31 = vrot.slane %v636_v58, 2  ;;  %v972_v63 = vrot.slane %v2758_v51, 1  ;;  %v1260_v4 = vrot.slane %v2758_v51, 2 }
 0x135   : > { %v2768_v38 = vsel %vm960_vm5, %v972_v63, %v974_v33  ;;  %v560_v3 = vpop.permute.xlu0 %559  ;;  %v2771_v44 = vsel %vm960_vm5, %v971_v61, %v972_v63  ;;  %v2774_v2 = vsel %vm1248_vm6, %v1259_v6, %v1260_v4  ;;  %v2777_v49 = vsel %vm1248_vm6, %v1260_v4, %v1262_v31 }
 0x136   : > { %3373 = vst [vmem:[#allocation9_spill] sm:$0xff] %v2774_v2  ;;  %v2783_v58 = vmul.f32 %v2687_v12, %v2771_v44  ;;  %v2788_v33 = vmul.f32 %v2679_v0, %v2768_v38  ;;  %v582_v6 = vsel %vm579_vm2, 0.0, %v560_v3  ;;  %v811_v0 = vmul.f32 %v2587_v21, %v2751_v46 }
 0x137   : > { %3374 = vst [vmem:[#allocation10_spill] sm:$0xff] %v2777_v49  ;;  %v568_v5 = vpop.permute.xlu1 %567  ;;  %1119 = vrot.lane.b32.xlu1 %v1103_v20, %s2216_s8  ;;  %v591_v4 = vsel %vm588_vm3, %v582_v6, 0.0  ;;  %v979_v20 = vrot.slane %v2745_v36, 1 }
 0x138   : > { %v586_v61 = vsel %vm579_vm2, 0.0, %v568_v5 }
 0x139   : > { %v595_v31 = vsel %vm588_vm3, %v586_v61, 0.0 }
 0x13a   : > { %v615_v63 = vrot.slane %v595_v31, 7  ;;  %v1173_v21 = vpop.permute.xlu2 %1172 }
 0x13c   : > { %v2795_v49 = vsel %vm605_vm4, %v615_v63, %v616_v10  ;;  %v2798_v12 = vsel %vm605_vm4, 0.0, %v615_v63  ;;  %v609_v10 = vrot.slane %v591_v4, 7 }
 0x13d   : > { %v1071_v11 = vpop.permute.xlu0 %1070  ;;  %v977_v5 = vrot.slane %v2795_v49, 1  ;;  %v976_v3 = vrot.slane %v2798_v12, 1  ;;  %v2808_v6 = vmul.f32 %v2685_v7, %v2795_v49  ;;  %v910_v8 = vmul.f32 %v2644_v45, %v2798_v12 }
 0x13e   : > { %v1104_v61 = vmul.f32 %v1071_v11, %v2729_v19 }
 0x13f   : > { %v562_v31 = vpop.permute.xlu1 %561  ;;  %831 = vrot.lane.b32.xlu1 %v811_v0, %s2216_s8  ;;  %v2812_v63 = vsel %vm960_vm5, %v977_v5, %v979_v20  ;;  %v2815_v41 = vsel %vm960_vm5, %v976_v3, %v977_v5  ;;  %v1267_v20 = vrot.slane %v2745_v36, 2  ;;  %v1264_v5 = vrot.slane %v2798_v12, 2 }
 0x140   : > { %v583_v2 = vsel %vm579_vm2, 0.0, %v562_v31  ;;  %1121 = vrot.lane.b32.xlu2 %v1104_v61, %s2216_s8  ;;  %v2821_v11 = vmul.f32 %v2708_v42, %v2815_v41  ;;  %v2826_v4 = vmul.f32 %v2689_v13, %v2812_v63  ;;  %v1265_v3 = vrot.slane %v2795_v49, 2 }
 0x141   : > { %v592_v7 = vsel %vm588_vm3, %v583_v2, 0.0  ;;  %v2832_v31 = vsel %vm605_vm4, 0.0, %v609_v10 }
 0x142   : > { %3375 = vst [vmem:[#allocation11_spill] sm:$0xff] %v2821_v11  ;;  %v610_v0 = vrot.slane %v592_v7, 7  ;;  %v2839_v2 = vsel %vm1248_vm6, %v1264_v5, %v1265_v3  ;;  %v2842_v13 = vsel %vm1248_vm6, %v1265_v3, %v1267_v20  ;;  %v1254_v5 = vrot.slane %v2832_v31, 2 }
 0x143   : > { %3376 = vst [vmem:[#allocation12_spill] sm:$0xff] %v2826_v4 }
 0x144   : > { %v2835_v61 = vsel %vm605_vm4, %v609_v10, %v610_v0  ;;  %v635_v42 = vsel %vm605_vm4, %v610_v0, 0.0  ;;  %3377 = vst [vmem:[#allocation13_spill] sm:$0xff] %v2839_v2 }
 0x145   : > { %3378 = vst [vmem:[#allocation14_spill] sm:$0xff] %v2842_v13  ;;  %v969_v36 = vrot.slane %v635_v42, 1  ;;  %v1257_v7 = vrot.slane %v635_v42, 2  ;;  %v1086_v4 = vpop.permute.xlu0 %1085  ;;  %v967_v40 = vrot.slane %v2835_v61, 1  ;;  %v1255_v11 = vrot.slane %v2835_v61, 2  ;;  %v1188_v13 = vpop.permute.xlu2 %1187 }
 0x147   : > { %v1168_v10 = vpop.permute.xlu1 %1167  ;;  %932 = vrot.lane.b32.xlu1 %v910_v8, %s2217_s13  ;;  %v970_v0 = vsel %vm960_vm5, %v967_v40, %v969_v36  ;;  %v2856_v42 = vsel %vm1248_vm6, %v1255_v11, %v1257_v7  ;;  %v2859_v45 = vsel %vm1248_vm6, %v1254_v5, %v1255_v11  ;;  %v1205_v8 = vmul.f32 %v1188_v13, %v2768_v38 }
 0x148   : > { %v1201_v20 = vmul.f32 %v1168_v10, %v2729_v19  ;;  %v2853_v3 = vmul.f32 %v2694_v18, %v970_v0  ;;  %v906_v18 = vmul.f32 %v2662_v53, %v2832_v31  ;;  %v907_v11 = vmul.f32 %v2629_v37, %v2835_v61 }
 0x149   : > { %v1106_v13 = vmul.f32 %v2691_v14, %v970_v0  ;;  %v809_v53 = vmul.f32 %v2651_v48, %v2832_v31  ;;  %v966_v37 = vrot.slane %v2832_v31, 1  ;;  %v812_v14 = vmul.f32 %v2664_v57, %v2758_v51 }
 0x14a   : > { %1218 = vrot.lane.b32.xlu0 %v1201_v20, %s2217_s13  ;;  %v1108_v48 = vmul.f32 %v2754_v50, %v2768_v38  ;;  %v814_v5 = vmul.f32 %v2599_v25, %v2795_v49  ;;  %v1109_v50 = vmul.f32 %v2779_v55, %v2815_v41  ;;  %v1107_v38 = vmul.f32 %v1086_v4, %v2771_v44 }
 0x14b   : > { %v810_v25 = vmul.f32 %v2634_v39, %v2835_v61  ;;  %v2046_v39 = vld [vmem:[%s3360_s5 + $0x1c8] sm:$0xff] }
 0x14d   : > { %v1101_v2 = vpop.permute.xlu0 %1100 }
 0x14e   : > { %v1110_v36 = vmul.f32 %v1101_v2, %v2812_v63  ;;  %v909_v2 = vmul.f32 %v2677_v62, %v2758_v51  ;;  %v2886_v62 = vsel %vm960_vm5, %v966_v37, %v967_v40  ;;  %v908_v40 = vmul.f32 %v2681_v1, %v2751_v46 }
 0x14f   : > { %1226 = vrot.lane.b32.xlu1 %v1205_v8, %s2217_s13  ;;  %v1202_v10 = vmul.f32 %v1173_v21, %v2886_v62  ;;  %v2043_v21 = vld [vmem:[%s3360_s5 + $0x1b0] sm:$0xff] }
 0x152   : > { %924 = vrot.lane.b32.xlu0 %v906_v18, %s2217_s13 }
 0x155   : > { %v1163_v19 = vpop.permute.xlu0 %1162 }
 0x156   : > { %v1200_v7 = vmul.f32 %v1163_v19, %v2726_v15  ;;  %v813_v15 = vmul.f32 %v2649_v47, %v2798_v12  ;;  %v1183_v47 = vpop.permute.xlu1 %1182  ;;  %v2042_v19 = vld [vmem:[%s3360_s5 + $0x1a8] sm:$0xff] }
 0x157   : > { %926 = vrot.lane.b32.xlu1 %v907_v11, %s2217_s13  ;;  %v1204_v57 = vmul.f32 %v1183_v47, %v2771_v44  ;;  %v1105_v44 = vmul.f32 %v2716_v60, %v2886_v62  ;;  %v2049_v60 = vld [vmem:[%s3360_s5 + $0x1e0] sm:$0xff] }
 0x158   : > { %1216 = vrot.lane.b32.xlu2 %v1200_v7, %s2217_s13  ;;  %v742_v7 = vmul.f32 %v2545_v30, %v2704_v35  ;;  %v2055_v30 = vld [vmem:[%s3360_s5 + $0x210] sm:$0xff]  ;;  %v2044_v35 = vld [vmem:[%s3360_s5 + $0x1b8] sm:$0xff] }
 0x15a   : > { %930 = vrot.lane.b32.xlu0 %v909_v2, %s2217_s13 }
 0x15d   : > { %v1178_v1 = vpop.permute.xlu0 %1177 }
 0x15e   : > { %v1198_v20 = vpop.permute.xlu1 %1197  ;;  %v1203_v8 = vmul.f32 %v1178_v1, %v970_v0  ;;  %v2929_v0 = vpop.permute.xlu2 %1293 }
 0x15f   : > { %1125 = vrot.lane.b32.xlu1 %v1106_v13, %s2216_s8  ;;  %v1207_v18 = vmul.f32 %v1198_v20, %v2812_v63  ;;  %v746_v20 = vmul.f32 %v2621_v34, %v2751_v46  ;;  %v2053_v34 = vld [vmem:[%s3360_s5 + $0x200] sm:$0xff]  ;;  %v744_v46 = vmul.f32 %v2592_v23, %v2832_v31  ;;  %v2056_v23 = vld [vmem:[%s3360_s5 + $0x218] sm:$0xff]  ;;  %v747_v31 = vmul.f32 %v2604_v27, %v2758_v51 }
 0x160   : > { %827 = vrot.lane.b32.xlu2 %v809_v53, %s2216_s8  ;;  %v750_v53 = vadd.f32 %v742_v7, %v2564_v56  ;;  %v2048_v56 = vld [vmem:[%s3360_s5 + $0x1d8] sm:$0xff]  ;;  %v1040_v27 = vmul.f32 %v2672_v59, %v2886_v62 }
 0x162   : > { %835 = vrot.lane.b32.xlu0 %v813_v15, %s2216_s8 }
 0x165   : > { %v1193_v4 = vpop.permute.xlu0 %1192 }
 0x166   : > { %v1289_v55 = vpop.permute.xlu1 %1288  ;;  %v1206_v2 = vmul.f32 %v1193_v4, %v2815_v41  ;;  %v2945_v13 = vpop.permute.xlu2 %1308  ;;  %v743_v41 = vmul.f32 %v2606_v28, %v2701_v32  ;;  %v2058_v28 = vld [vmem:[%s3360_s5 + $0x228] sm:$0xff]  ;;  %v2047_v32 = vld [vmem:[%s3360_s5 + $0x1d0] sm:$0xff] }
 0x167   : > { %1220 = vrot.lane.b32.xlu1 %v1202_v10, %s2217_s13 }
 0x168   : > { %833 = vrot.lane.b32.xlu2 %v812_v14, %s2216_s8 }
 0x16a   : > { %1129 = vrot.lane.b32.xlu0 %v1108_v48, %s2216_s8 }
 0x16d   : > { %v2937_v63 = vpop.permute.xlu0 %1298 }
 0x16e   : > { %v2935_v11 = vpop.permute.xlu1 %1303 }
 0x16f   : > { %837 = vrot.lane.b32.xlu1 %v814_v5, %s2216_s8  ;;  %v751_v5 = vadd.f32 %v743_v41, %v2553_v43  ;;  %v2051_v43 = vld [vmem:[%s3360_s5 + $0x1f0] sm:$0xff] }
 0x170   : > { %928 = vrot.lane.b32.xlu2 %v908_v40, %s2217_s13 }
 0x172   : > { %1224 = vrot.lane.b32.xlu0 %v1204_v57, %s2217_s13 }
 0x177   : > { %1131 = vrot.lane.b32.xlu1 %v1109_v50, %s2216_s8 }
 0x178   : > { %1127 = vrot.lane.b32.xlu2 %v1107_v38, %s2216_s8 }
 0x17a   : > { %829 = vrot.lane.b32.xlu0 %v810_v25, %s2216_s8 }
 0x17f   : > { %1318 = vperm.xlu1 %2132, %v2043_v21  }
 0x180   : > { %1222 = vrot.lane.b32.xlu2 %v1203_v8, %s2217_s13  ;;  %v2050_v8 = vld [vmem:[%s3360_s5 + $0x1e8] sm:$0xff] }
 0x182   : > { %1123 = vrot.lane.b32.xlu0 %v1105_v44, %s2216_s8  ;;  %v923_v47 = vpop.permute.xlu2 %922  ;;  %v754_v44 = vadd.f32 %v746_v20, %v2562_v54  ;;  %v2057_v54 = vld [vmem:[%s3360_s5 + $0x220] sm:$0xff]  ;;  %v3379_v20 = vld [vmem:[#allocation11_spill] sm:$0xff] }
 0x187   : > { %1358 = vperm.xlu1 %2132, %v2046_v39  }
 0x188   : > { %934 = vrot.lane.b32.xlu2 %v2808_v6, %s2217_s13  ;;  %v2052_v6 = vld [vmem:[%s3360_s5 + $0x1f8] sm:$0xff] }
 0x18a   : > { %1230 = vrot.lane.b32.xlu0 %v1207_v18, %s2217_s13 }
 0x18f   : > { %1373 = vperm.xlu1 %2132, %v2049_v60   ;;  %v1326_v60 = vmul.f32 %v1289_v55, %v2739_v26 }
 0x190   : > { %1133 = vrot.lane.b32.xlu2 %v1110_v36, %s2216_s8  ;;  %v2045_v36 = vld [vmem:[%s3360_s5 + $0x1c0] sm:$0xff] }
 0x192   : > { %1313 = vperm.xlu0 %2131, %v2042_v19  }
 0x197   : > { %1388 = vperm.xlu1 %2132, %v2052_v6  }
 0x198   : > { %1228 = vrot.lane.b32.xlu2 %v1206_v2, %s2217_s13  ;;  %v752_v2 = vadd.f32 %v744_v46, %v2524_v16  ;;  %v3382_v46 = vld [vmem:[#allocation9_spill] sm:$0xff] }
 0x199   : > { %v824_v37 = vpop.permute.xlu0 %823  ;;  %v921_v15 = vpop.permute.xlu1 %920 }
 0x19a   : > { %v847_v10 = vadd.f32 %v824_v37, %v750_v53  ;;  %1353 = vperm.xlu0 %2131, %v2045_v36   ;;  %v1122_v38 = vpop.permute.xlu2 %1121  ;;  %v1327_v37 = vmul.f32 %v2929_v0, %v2736_v17 }
 0x19c   : > { %v944_v14 = vadd.f32 %v921_v15, %v847_v10  ;;  %v2060_v10 = vld [vmem:[%s3360_s5 + $0x238] sm:$0xff] }
 0x19e   : > { %v1046_v48 = vadd.f32 %v2742_v29, %v944_v14 }
 0x19f   : > { %1460 = vperm.xlu1 %2132, %v2055_v30   ;;  %v755_v30 = vadd.f32 %v747_v31, %v2537_v22 }
 0x1a0   : > { %1323 = vperm.xlu2 %2133, %v2044_v35  }
 0x1a1   : > { %v826_v40 = vpop.permute.xlu1 %825 }
 0x1a2   : > { %v848_v57 = vadd.f32 %v826_v40, %v751_v5  ;;  %1368 = vperm.xlu0 %2131, %v2048_v56  }
 0x1a4   : > { %v945_v50 = vadd.f32 %v923_v47, %v848_v57  ;;  %v2059_v47 = vld [vmem:[%s3360_s5 + $0x230] sm:$0xff] }
 0x1a6   : > { %v1047_v29 = vadd.f32 %v2733_v9, %v945_v50  ;;  %v2054_v9 = vld [vmem:[%s3360_s5 + $0x208] sm:$0xff] }
 0x1a7   : > { %1475 = vperm.xlu1 %2132, %v2058_v28   ;;  %v748_v28 = vmul.f32 %v2560_v52, %v2798_v12  ;;  %v3381_v12 = vld [vmem:[#allocation6_spill] sm:$0xff] }
 0x1a8   : > { %1363 = vperm.xlu2 %2133, %v2047_v32   ;;  %v1144_v25 = vadd.f32 %v1122_v38, %v1047_v29 }
 0x1a9   : > { %v1120_v1 = vpop.permute.xlu1 %1119 }
 0x1aa   : > { %v1143_v21 = vadd.f32 %v1120_v1, %v1046_v48  ;;  %1383 = vperm.xlu0 %2131, %v2051_v43  }
 0x1b0   : > { %1378 = vperm.xlu2 %2133, %v2050_v8  }
 0x1b1   : > { %v832_v39 = vpop.permute.xlu1 %831 }
 0x1b2   : > { %v851_v4 = vadd.f32 %v832_v39, %v754_v44  ;;  %1455 = vperm.xlu0 %2131, %v2054_v9   ;;  %v1217_v18 = vpop.permute.xlu2 %1216 }
 0x1b3   : > { %v1240_v19 = vadd.f32 %v1217_v18, %v1143_v21 }
 0x1b5   : > { %v2990_v6 = vadd.f32 %v1326_v60, %v1240_v19 }
 0x1b8   : > { %1450 = vperm.xlu2 %2133, %v2053_v34  }
 0x1b9   : > { %v933_v7 = vpop.permute.xlu1 %932 }
 0x1ba   : > { %1470 = vperm.xlu0 %2131, %v2057_v54   ;;  %v828_v55 = vpop.permute.xlu2 %827  ;;  %v1330_v54 = vmul.f32 %v2945_v13, %v3382_v46 }
 0x1bb   : > { %v849_v36 = vadd.f32 %v828_v55, %v752_v2  ;;  %v3383_v2 = vld [vmem:[#allocation12_spill] sm:$0xff] }
 0x1bc   : > { %v1219_v53 = vpop.permute.xlu0 %1218 }
 0x1bd   : > { %v1241_v15 = vadd.f32 %v1219_v53, %v1144_v25  ;;  %v756_v25 = vadd.f32 %v748_v28, %v2594_v24 }
 0x1bf   : > { %v3006_v16 = vadd.f32 %v1327_v37, %v1241_v15 }
 0x1c0   : > { %1465 = vperm.xlu2 %2133, %v2056_v23  }
 0x1c1   : > { %v1227_v14 = vpop.permute.xlu1 %1226 }
 0x1c2   : > { %1485 = vperm.xlu0 %2131, %v2060_v10   ;;  %v834_v0 = vpop.permute.xlu2 %833  ;;  %v3385_v10 = vld [vmem:[#allocation7_spill] sm:$0xff] }
 0x1c3   : > { %v852_v41 = vadd.f32 %v834_v0, %v755_v30 }
 0x1c4   : > { %v925_v35 = vpop.permute.xlu0 %924 }
 0x1c5   : > { %v946_v48 = vadd.f32 %v925_v35, %v849_v36  ;;  %v3384_v36 = vld [vmem:[#allocation5_spill] sm:$0xff] }
 0x1c6   : > { %v745_v53 = vmul.f32 %v3384_v36, %v2835_v61 }
 0x1c7   : > { %v1048_v51 = vadd.f32 %v1040_v27, %v946_v48  ;;  %v3386_v48 = vld [vmem:[#allocation13_spill] sm:$0xff] }
 0x1c8   : > { %1480 = vperm.xlu2 %2133, %v2059_v47  }
 0x1c9   : > { %v927_v56 = vpop.permute.xlu1 %926 }
 0x1ca   : > { %v929_v5 = vpop.permute.xlu2 %928 }
 0x1cb   : > { %v948_v40 = vadd.f32 %v929_v5, %v851_v4 }
 0x1cc   : > { %v931_v57 = vpop.permute.xlu0 %930 }
 0x1cd   : > { %v949_v50 = vadd.f32 %v931_v57, %v852_v41  ;;  %v1050_v22 = vadd.f32 %v2783_v58, %v948_v40  ;;  %v3380_v58 = vld [vmem:[#allocation8_spill] sm:$0xff]  ;;  %v1329_v57 = vmul.f32 %v2935_v11, %v2856_v42 }
 0x1ce   : > { %v749_v39 = vmul.f32 %v3380_v58, %v2795_v49 }
 0x1cf   : > { %v1051_v32 = vadd.f32 %v2788_v33, %v949_v50 }
 0x1d0   : > { %v757_v33 = vadd.f32 %v749_v39, %v3381_v12 }
 0x1d1   : > { %v1126_v29 = vpop.permute.xlu1 %1125 }
 0x1d2   : > { %v1128_v38 = vpop.permute.xlu2 %1127 }
 0x1d3   : > { %v1147_v43 = vadd.f32 %v1128_v38, %v1050_v22 }
 0x1d4   : > { %v836_v59 = vpop.permute.xlu0 %835 }
 0x1d5   : > { %v853_v62 = vadd.f32 %v836_v59, %v756_v25  ;;  %v3387_v59 = vld [vmem:[#allocation14_spill] sm:$0xff] }
 0x1d7   : > { %v950_v1 = vadd.f32 %v933_v7, %v853_v62 }
 0x1d9   : > { %v1221_v21 = vpop.permute.xlu1 %1220  ;;  %v1052_v8 = vadd.f32 %v3379_v20, %v950_v1 }
 0x1da   : > { %v1223_v9 = vpop.permute.xlu2 %1222 }
 0x1dc   : > { %v1130_v44 = vpop.permute.xlu0 %1129 }
 0x1dd   : > { %v1148_v4 = vadd.f32 %v1130_v44, %v1051_v32  ;;  %v1328_v32 = vmul.f32 %v2937_v63, %v2859_v45  ;;  %v3388_v44 = vld [vmem:[#allocation10_spill] sm:$0xff] }
 0x1df   : > { %v1245_v52 = vadd.f32 %v1227_v14, %v1148_v4  ;;  %v753_v14 = vadd.f32 %v745_v53, %v3385_v10 }
 0x1e1   : > { %v838_v18 = vpop.permute.xlu1 %837 }
 0x1e2   : > { %v854_v60 = vadd.f32 %v838_v18, %v757_v33  ;;  %v935_v19 = vpop.permute.xlu2 %934 }
 0x1e4   : > { %v951_v34 = vadd.f32 %v935_v19, %v854_v60  ;;  %v1225_v24 = vpop.permute.xlu0 %1224 }
 0x1e5   : > { %v1244_v7 = vadd.f32 %v1225_v24, %v1147_v43 }
 0x1e6   : > { %v1053_v55 = vadd.f32 %v3383_v2, %v951_v34 }
 0x1e7   : > { %v3028_v37 = vadd.f32 %v1330_v54, %v1244_v7 }
 0x1e9   : > { %v1132_v49 = vpop.permute.xlu1 %1131 }
 0x1ea   : > { %v1149_v15 = vadd.f32 %v1132_v49, %v1052_v8  ;;  %v1134_v23 = vpop.permute.xlu2 %1133 }
 0x1eb   : > { %v1150_v31 = vadd.f32 %v1134_v23, %v1053_v55 }
 0x1ec   : > { %v830_v30 = vpop.permute.xlu0 %829 }
 0x1ed   : > { %v850_v0 = vadd.f32 %v830_v30, %v753_v14 }
 0x1ef   : > { %v947_v41 = vadd.f32 %v927_v56, %v850_v0 }
 0x1f1   : > { %v1049_v35 = vadd.f32 %v2853_v3, %v947_v41  ;;  %v1319_v13 = vpop.permute.xlu1 %1318 }
 0x1f2   : > { %v1332_v47 = vmul.f32 %v1319_v13, %v3386_v48  ;;  %v1229_v27 = vpop.permute.xlu2 %1228 }
 0x1f3   : > { %v1246_v5 = vadd.f32 %v1229_v27, %v1149_v15  ;;  %v1146_v40 = vadd.f32 %v1126_v29, %v1049_v35 }
 0x1f4   : > { %v1124_v61 = vpop.permute.xlu0 %1123 }
 0x1f5   : > { %v1145_v50 = vadd.f32 %v1124_v61, %v1048_v51  ;;  %v1243_v22 = vadd.f32 %v1223_v9, %v1146_v40  ;;  %v3035_v28 = vadd.f32 %v1332_v47, %v1246_v5 }
 0x1f7   : > { %v1242_v56 = vadd.f32 %v1221_v21, %v1145_v50  ;;  %v3039_v38 = vadd.f32 %v1329_v57, %v1243_v22 }
 0x1f9   : > { %v1359_v3 = vpop.permute.xlu1 %1358  ;;  %v3041_v43 = vadd.f32 %v1328_v32, %v1242_v56 }
 0x1fa   : > { %v1392_v25 = vmul.f32 %v1359_v3, %v2736_v17  ;;  %v1324_v29 = vpop.permute.xlu2 %1323 }
 0x1fb   : > { %v1333_v62 = vmul.f32 %v1324_v29, %v3387_v59 }
 0x1fc   : > { %v1231_v1 = vpop.permute.xlu0 %1230  ;;  %1409 = vrot.lane.b32.xlu2 %v1392_v25, %s2216_s8 }
 0x1fd   : > { %v1247_v11 = vadd.f32 %v1231_v1, %v1150_v31 }
 0x1ff   : > { %v1341_v51 = vadd.f32 %v1333_v62, %v1247_v11 }
 0x201   : > { %v1374_v20 = vpop.permute.xlu1 %1373 }
 0x202   : > { %v1395_v8 = vmul.f32 %v1374_v20, %v3382_v46  ;;  %v1364_v63 = vpop.permute.xlu2 %1363 }
 0x203   : > { %v1393_v21 = vmul.f32 %v1364_v63, %v2859_v45 }
 0x204   : > { %v1314_v9 = vpop.permute.xlu0 %1313  ;;  %1415 = vrot.lane.b32.xlu2 %v1395_v8, %s2216_s8 }
 0x205   : > { %v1331_v58 = vmul.f32 %v1314_v9, %v3388_v44  ;;  %1411 = vrot.lane.b32.xlu0 %v1393_v21, %s2216_s8 }
 0x207   : > { %v1339_v39 = vadd.f32 %v1331_v58, %v1245_v52 }
 0x209   : > { %v1389_v4 = vpop.permute.xlu1 %1388 }
 0x20a   : > { %v1398_v12 = vmul.f32 %v1389_v4, %v3387_v59  ;;  %v1379_v33 = vpop.permute.xlu2 %1378 }
 0x20b   : > { %v1396_v18 = vmul.f32 %v1379_v33, %v3388_v44 }
 0x20c   : > { %v1354_v60 = vpop.permute.xlu0 %1353  ;;  %1421 = vrot.lane.b32.xlu2 %v1398_v12, %s2216_s8 }
 0x20d   : > { %v1391_v19 = vmul.f32 %v1354_v60, %v2739_v26  ;;  %1417 = vrot.lane.b32.xlu0 %v1396_v18, %s2216_s8 }
 0x20f   : > { %1407 = vrot.lane.b32.xlu1 %v1391_v19, %s2216_s8 }
 0x211   : > { %v1461_v34 = vpop.permute.xlu1 %1460 }
 0x212   : > { %v1490_v24 = vmul.f32 %v1461_v34, %v2859_v45  ;;  %v1451_v54 = vpop.permute.xlu2 %1450 }
 0x213   : > { %v1488_v52 = vmul.f32 %v1451_v54, %v2739_v26 }
 0x214   : > { %v1369_v7 = vpop.permute.xlu0 %1368  ;;  %1508 = vrot.lane.b32.xlu2 %v1490_v24, %s2217_s13 }
 0x215   : > { %v1394_v2 = vmul.f32 %v1369_v7, %v2856_v42  ;;  %1504 = vrot.lane.b32.xlu0 %v1488_v52, %s2217_s13 }
 0x217   : > { %1413 = vrot.lane.b32.xlu1 %v1394_v2, %s2216_s8 }
 0x219   : > { %v1476_v55 = vpop.permute.xlu1 %1475 }
 0x21a   : > { %v1493_v36 = vmul.f32 %v1476_v55, %v3388_v44  ;;  %v1466_v53 = vpop.permute.xlu2 %1465 }
 0x21b   : > { %v1491_v49 = vmul.f32 %v1466_v53, %v2856_v42 }
 0x21c   : > { %v1384_v15 = vpop.permute.xlu0 %1383  ;;  %1514 = vrot.lane.b32.xlu2 %v1493_v36, %s2217_s13 }
 0x21d   : > { %v1397_v26 = vmul.f32 %v1384_v15, %v3386_v48  ;;  %1510 = vrot.lane.b32.xlu0 %v1491_v49, %s2217_s13 }
 0x21f   : > { %1419 = vrot.lane.b32.xlu1 %v1397_v26, %s2216_s8  ;;  %s269_s8 = sand.u32 1, %s2204_s25  }
 0x220   : > { %s1897_s28 = scalar_lea.sflag [#allocation3], %s269_s8 }
 0x222   : > { %v1481_v45 = vpop.permute.xlu2 %1480 }
 0x223   : > { %v1494_v23 = vmul.f32 %v1481_v45, %v3386_v48 }
 0x224   : > { %v1456_v31 = vpop.permute.xlu0 %1455 }
 0x225   : > { %v1489_v10 = vmul.f32 %v1456_v31, %v2736_v17  ;;  %1516 = vrot.lane.b32.xlu0 %v1494_v23, %s2217_s13 }
 0x227   : > { %1506 = vrot.lane.b32.xlu1 %v1489_v10, %s2217_s13 }
 0x22c   : > { %v1471_v42 = vpop.permute.xlu0 %1470 }
 0x22d   : > { %v1492_v14 = vmul.f32 %v1471_v42, %v3382_v46 }
 0x22f   : > { %1512 = vrot.lane.b32.xlu1 %v1492_v14, %s2217_s13 }
 0x234   : > { %v1486_v30 = vpop.permute.xlu0 %1485 }
 0x235   : > { %v1495_v0 = vmul.f32 %v1486_v30, %v3387_v59 }
 0x237   : > { %1518 = vrot.lane.b32.xlu1 %v1495_v0, %s2217_s13  ;;  %s1978_s13 = sshll.u32 %s269_s8, 6 }
 0x238   : > { %s3215_s15 = scalar_lea.vmem [#allocation2], %s1978_s13 }
 0x239   : > { %s1909_s20 = sshll.u32 %s3215_s15, 4  ;;  %s1910_s20 = int_to_ptr.vmem [resolvable:$true] %s1909_s20 }
 0x256   : > { %v1410_v41 = vpop.permute.xlu2 %1409 }
 0x257   : > { %v3078_v35 = vadd.f32 %v1410_v41, %v3006_v16 }
 0x25e   : > { %v1416_v13 = vpop.permute.xlu2 %1415 }
 0x25f   : > { %v3081_v17 = vadd.f32 %v1416_v13, %v3028_v37 }
 0x266   : > { %v1422_v48 = vpop.permute.xlu2 %1421 }
 0x267   : > { %v3083_v47 = vadd.f32 %v1422_v48, %v1341_v51 }
 0x26e   : > { %v1509_v27 = vpop.permute.xlu2 %1508 }
 0x276   : > { %v1515_v22 = vpop.permute.xlu2 %1514 }
 0x277   : > { %v1412_v46 = vpop.permute.xlu0 %1411 }
 0x278   : > { %v1433_v5 = vadd.f32 %v1412_v46, %v3041_v43 }
 0x27a   : > { %v3086_v40 = vadd.f32 %v1509_v27, %v1433_v5 }
 0x27c   : > { %v3089_v61 = vmul.f32 0.70710677, %v3086_v40 }
 0x27e   : > { %v1632_v16 = vmul.f32 %v3089_v61, %v3089_v61 }
 0x27f   : > { %v1418_v57 = vpop.permute.xlu0 %1417 }
 0x280   : > { %v3093_v50 = vmin.f32 %v1632_v16, 16.0  ;;  %v1436_v37 = vadd.f32 %v1418_v57, %v1339_v39 }
 0x281   : > { %v1408_v32 = vpop.permute.xlu1 %1407 }
 0x282   : > { %v1634_v56 = vmul.f32 2.1237322e-06, %v3093_v50  ;;  %v1645_v3 = vmul.f32 3.8918573e-05, %v3093_v50  ;;  %v3097_v25 = vadd.f32 %v1515_v22, %v1436_v37  ;;  %v1431_v11 = vadd.f32 %v1408_v32, %v2990_v6 }
 0x284   : > { %v1635_v43 = vadd.f32 0.00028619796, %v1634_v56  ;;  %v1646_v29 = vadd.f32 0.001143296, %v1645_v3  ;;  %v3100_v59 = vmul.f32 0.70710677, %v3097_v25 }
 0x286   : > { %v1636_v62 = vmul.f32 %v1635_v43, %v3093_v50  ;;  %v1647_v1 = vmul.f32 %v1646_v29, %v3093_v50  ;;  %v1752_v51 = vmul.f32 %v3100_v59, %v3100_v59 }
 0x287   : > { %v1505_v20 = vpop.permute.xlu0 %1504 }
 0x288   : > { %v1637_v8 = vadd.f32 0.0036580483, %v1636_v62  ;;  %v1648_v63 = vadd.f32 0.014752088, %v1647_v1  ;;  %v3107_v21 = vadd.f32 %v1505_v20, %v1431_v11  ;;  %v3109_v9 = vmin.f32 %v1752_v51, 16.0 }
 0x289   : > { %v1414_v44 = vpop.permute.xlu1 %1413 }
 0x28a   : > { %v1638_v58 = vmul.f32 %v1637_v8, %v3093_v50  ;;  %v1649_v39 = vmul.f32 %v1648_v63, %v3093_v50  ;;  %v3114_v4 = vmul.f32 0.70710677, %v3107_v21  ;;  %v1754_v6 = vmul.f32 2.1237322e-06, %v3109_v9 }
 0x28b   : > { %v1765_v12 = vmul.f32 3.8918573e-05, %v3109_v9  ;;  %v1434_v52 = vadd.f32 %v1414_v44, %v3039_v38 }
 0x28c   : > { %v1639_v33 = vadd.f32 0.05243302, %v1638_v58  ;;  %v1650_v18 = vadd.f32 0.112945676, %v1649_v39  ;;  %v1552_v60 = vmul.f32 %v3114_v4, %v3114_v4  ;;  %v1755_v19 = vadd.f32 0.00028619796, %v1754_v6 }
 0x28d   : > { %v1766_v34 = vadd.f32 0.001143296, %v1765_v12 }
 0x28e   : > { %v1651_v24 = vmul.f32 %v1650_v18, %v3093_v50  ;;  %v3121_v54 = vmin.f32 %v1552_v60, 16.0  ;;  %v1756_v7 = vmul.f32 %v1755_v19, %v3109_v9  ;;  %v1640_v36 = vmul.f32 %v1639_v33, %v3093_v50 }
 0x28f   : > { %v1767_v2 = vmul.f32 %v1766_v34, %v3109_v9  ;;  %v1511_v55 = vpop.permute.xlu0 %1510  ;;  %v3158_v33 = vmul.f32 0.5, %v3086_v40 }
 0x290   : > { %v1652_v53 = vadd.f32 0.4994258, %v1651_v24  ;;  %v1554_v49 = vmul.f32 2.1237322e-06, %v3121_v54  ;;  %v3128_v15 = vadd.f32 %v1511_v55, %v1434_v52  ;;  %v1757_v26 = vadd.f32 0.0036580483, %v1756_v7 }
 0x291   : > { %v1768_v45 = vadd.f32 0.014752088, %v1767_v2  ;;  %v1565_v23 = vmul.f32 3.8918573e-05, %v3121_v54  ;;  %v1420_v0 = vpop.permute.xlu1 %1419  ;;  %v1641_v41 = vadd.f32 0.18741608, %v1640_v36 }
 0x292   : > { %v1653_v31 = vmul.f32 %v1652_v53, %v3093_v50  ;;  %v1555_v10 = vadd.f32 0.00028619796, %v1554_v49  ;;  %v1758_v38 = vmul.f32 %v1757_v26, %v3109_v9  ;;  %v3135_v30 = vmul.f32 0.70710677, %v3128_v15 }
 0x293   : > { %v1769_v42 = vmul.f32 %v1768_v45, %v3109_v9  ;;  %v1566_v14 = vadd.f32 0.001143296, %v1565_v23  ;;  %v1437_v57 = vadd.f32 %v1420_v0, %v3035_v28  ;;  %v1642_v62 = vmul.f32 %v1641_v41, %v3093_v50 }
 0x294   : > { %v1654_v13 = vadd.f32 1.0, %v1653_v31  ;;  %v1556_v48 = vmul.f32 %v1555_v10, %v3121_v54  ;;  %v1759_v27 = vadd.f32 0.05243302, %v1758_v38  ;;  %v1672_v16 = vmul.f32 %v3135_v30, %v3135_v30 }
 0x295   : > { %v1770_v46 = vadd.f32 0.112945676, %v1769_v42  ;;  %v1567_v5 = vmul.f32 %v1566_v14, %v3121_v54  ;;  %v1643_v18 = vadd.f32 1.1283791, %v1642_v62  ;;  %v3167_v36 = vmul.f32 0.5, %v3097_v25 }
 0x296   : > { %2134 = vrcp.f32 %v1654_v13  ;;  %v1760_v37 = vmul.f32 %v1759_v27, %v3109_v9  ;;  %v1557_v32 = vadd.f32 0.0036580483, %v1556_v48  ;;  %v3144_v43 = vmin.f32 %v1672_v16, 16.0 }
 0x297   : > { %v1771_v22 = vmul.f32 %v1770_v46, %v3109_v9  ;;  %v1517_v56 = vpop.permute.xlu0 %1516  ;;  %v1568_v3 = vadd.f32 0.014752088, %v1567_v5  ;;  %v1664_v55 = vand.u32 2147483647, %v1654_v13  ;;  %v1666_v40 = vand.u32 2147483648, %v1654_v13 }
 0x298   : > { %v3146_v29 = vadd.f32 %v1517_v56, %v1437_v57  ;;  %v1558_v11 = vmul.f32 %v1557_v32, %v3121_v54  ;;  %v1761_v51 = vadd.f32 0.18741608, %v1760_v37  ;;  %v1674_v28 = vmul.f32 2.1237322e-06, %v3144_v43 }
 0x299   : > { %v1772_v1 = vadd.f32 0.4994258, %v1771_v22  ;;  %v1569_v20 = vmul.f32 %v1568_v3, %v3121_v54  ;;  %v1685_v8 = vmul.f32 3.8918573e-05, %v3144_v43  ;;  %v1507_v31 = vpop.permute.xlu1 %1506  ;;  %v1644_v10 = vmul.f32 %v1643_v18, %v3089_v61 }
 0x29a   : > { %v1559_v44 = vadd.f32 0.05243302, %v1558_v11  ;;  %v3155_v58 = vmul.f32 0.70710677, %v3146_v29  ;;  %v1675_v12 = vadd.f32 0.00028619796, %v1674_v28  ;;  %v1762_v34 = vmul.f32 %v1761_v51, %v3109_v9 }
 0x29b   : > { %v1773_v63 = vmul.f32 %v1772_v1, %v3109_v9  ;;  %v1570_v6 = vadd.f32 0.112945676, %v1569_v20  ;;  %v1686_v50 = vadd.f32 0.001143296, %v1685_v8  ;;  %vm1660_vm8 = vweird.f32 %v1654_v13 }
 0x29c   : > { %v2135_v39 = vpop.eup %2134  ;;  %v1676_v52 = vmul.f32 %v1675_v12, %v3144_v43  ;;  %v1560_v53 = vmul.f32 %v1559_v44, %v3121_v54  ;;  %v1792_v9 = vmul.f32 %v3155_v58, %v3155_v58  ;;  %v1763_v38 = vadd.f32 1.1283791, %v1762_v34 }
 0x29d   : > { %v1656_v60 = vmul.f32 %v2135_v39, %v1654_v13  ;;  %v3160_v19 = vadd.f32 1.0, %v1773_v63  ;;  %v1571_v24 = vmul.f32 %v1570_v6, %v3121_v54  ;;  %v1687_v7 = vmul.f32 %v1686_v50, %v3144_v43 }
 0x29e   : > { %vm1661_vm7 = vweird.f32 %v2135_v39  ;;  %v1677_v45 = vadd.f32 0.0036580483, %v1676_v52  ;;  %v3174_v25 = vmin.f32 %v1792_v9, 16.0  ;;  %vm1665_vm10 = vcmp.eq.f32.partialorder %v1664_v55, 8.507059e+37 }
 0x29f   : > { %v1657_v2 = vsub.f32 1.0, %v1656_v60  ;;  %2136 = vrcp.f32 %v3160_v19  ;;  %v1572_v26 = vadd.f32 0.4994258, %v1571_v24  ;;  %v1688_v23 = vadd.f32 0.014752088, %v1687_v7  ;;  %vm1662_vm9 = vmor %vm1660_vm8, %vm1661_vm7 }
 0x2a0   : > { %v1678_v0 = vmul.f32 %v1677_v45, %v3144_v43  ;;  %v1667_v48 = vor.u32 1.1754944e-38, %v1666_v40  ;;  %v1561_v27 = vadd.f32 0.18741608, %v1560_v53  ;;  %v1794_v46 = vmul.f32 2.1237322e-06, %v3174_v25 }
 0x2a1   : > { %v1658_v49 = vmul.f32 %v2135_v39, %v1657_v2  ;;  %v1573_v14 = vmul.f32 %v1572_v26, %v3121_v54  ;;  %v1689_v41 = vmul.f32 %v1688_v23, %v3144_v43  ;;  %v1805_v57 = vmul.f32 3.8918573e-05, %v3174_v25  ;;  %v1513_v18 = vpop.permute.xlu1 %1512 }
 0x2a2   : > { %v3187_v32 = vmul.f32 0.5, %v3107_v21  ;;  %v3190_v56 = vadd.f32 %v1507_v31, %v3078_v35  ;;  %v1764_v62 = vmul.f32 %v1763_v38, %v3100_v59  ;;  %v1679_v1 = vadd.f32 0.05243302, %v1678_v0 }
 0x2a3   : > { %v1659_v42 = vadd.f32 %v2135_v39, %v1658_v49  ;;  %v3181_v5 = vadd.f32 1.0, %v1573_v14  ;;  %v1690_v16 = vadd.f32 0.112945676, %v1689_v41  ;;  %vm1780_vm11 = vweird.f32 %v3160_v19 }
 0x2a4   : > { %v1786_v51 = vand.u32 2147483648, %v3160_v19  ;;  %v1562_v28 = vmul.f32 %v1561_v27, %v3121_v54  ;;  %v1795_v35 = vadd.f32 0.00028619796, %v1794_v46  ;;  %v1806_v8 = vadd.f32 0.001143296, %v1805_v57 }
 0x2a5   : > { %v2137_v61 = vpop.eup %2136  ;;  %v1663_v13 = vsel %vm1662_vm9, %v2135_v39, %v1659_v42  ;;  %2138 = vrcp.f32 %v3181_v5  ;;  %v1691_v20 = vmul.f32 %v1690_v16, %v3144_v43  ;;  %v1784_v59 = vand.u32 2147483647, %v3160_v19 }
 0x2a6   : > { %v1668_v37 = vsel %vm1665_vm10, %v1667_v48, %v1663_v13  ;;  %v1776_v22 = vmul.f32 %v2137_v61, %v3160_v19  ;;  %vm1781_vm12 = vweird.f32 %v2137_v61  ;;  %v1680_v6 = vmul.f32 %v1679_v1, %v3144_v43 }
 0x2a7   : > { %v1669_v3 = vmul.f32 %v1668_v37, %v1644_v10  ;;  %v1692_v44 = vadd.f32 0.4994258, %v1691_v20  ;;  %v1796_v12 = vmul.f32 %v1795_v35, %v3174_v25  ;;  %v1807_v50 = vmul.f32 %v1806_v8, %v3174_v25  ;;  %vm1782_vm13 = vmor %vm1780_vm11, %vm1781_vm12 }
 0x2a8   : > { %v1777_v11 = vsub.f32 1.0, %v1776_v22  ;;  %v1787_v34 = vor.u32 1.1754944e-38, %v1786_v51  ;;  %v3206_v54 = vmul.f32 0.70710677, %v3190_v56  ;;  %v1563_v2 = vadd.f32 1.1283791, %v1562_v28 }
 0x2a9   : > { %v2063_v21 = vclamps-f32 %v1669_v3, 1.0  ;;  %v1693_v24 = vmul.f32 %v1692_v44, %v3144_v43  ;;  %v1797_v55 = vadd.f32 0.0036580483, %v1796_v12  ;;  %v1808_v40 = vadd.f32 0.014752088, %v1807_v50 }
 0x2aa   : > { %v1778_v63 = vmul.f32 %v2137_v61, %v1777_v11  ;;  %vm1785_vm14 = vcmp.eq.f32.partialorder %v1784_v59, 8.507059e+37  ;;  %v3213_v49 = vadd.f32 %v1513_v18, %v3081_v17  ;;  %v1592_v38 = vmul.f32 %v3206_v54, %v3206_v54 }
 0x2ab   : > { %v1874_v39 = vadd.f32 1.0, %v2063_v21  ;;  %v2139_v52 = vpop.eup %2138  ;;  %v3219_v45 = vadd.f32 1.0, %v1693_v24  ;;  %v1809_v19 = vmul.f32 %v1808_v40, %v3174_v25  ;;  %v1798_v10 = vmul.f32 %v1797_v55, %v3174_v25 }
 0x2ac   : > { %v1779_v60 = vadd.f32 %v2137_v61, %v1778_v63  ;;  %v1576_v9 = vmul.f32 %v2139_v52, %v3181_v5  ;;  %v1564_v17 = vmul.f32 %v1563_v2, %v3114_v4  ;;  %v1584_v42 = vand.u32 2147483647, %v3181_v5 }
 0x2ad   : > { %v1882_v7 = vmul.f32 %v1874_v39, %v3158_v33  ;;  %v1681_v33 = vadd.f32 0.18741608, %v1680_v6  ;;  %v1586_v14 = vand.u32 2147483648, %v3181_v5  ;;  %2140 = vrcp.f32 %v3219_v45 }
 0x2ae   : > { %v1783_v53 = vsel %vm1782_vm13, %v2137_v61, %v1779_v60  ;;  %v1577_v31 = vsub.f32 1.0, %v1576_v9  ;;  %vm1581_vm15 = vweird.f32 %v2139_v52  ;;  %v1810_v48 = vadd.f32 0.112945676, %v1809_v19 }
 0x2af   : > { %1890 = vst.msk [vmem:[%s3215_s15 + $0x10] sm:$0xff] %vm287_vm0, %v1882_v7  ;;  %v1788_v26 = vsel %vm1785_vm14, %v1787_v34, %v1783_v53  ;;  %vm1580_vm1 = vweird.f32 %v3181_v5  ;;  %v1682_v27 = vmul.f32 %v1681_v33, %v3144_v43  ;;  %v3231_v46 = vmin.f32 %v1592_v38, 16.0  ;;  %v1519_v34 = vpop.permute.xlu1 %1518 }
 0x2b0   : > { %v1789_v23 = vmul.f32 %v1788_v26, %v1764_v62  ;;  %v1578_v41 = vmul.f32 %v2139_v52, %v1577_v31  ;;  %v3234_v61 = vmul.f32 0.70710677, %v3213_v49  ;;  %v1799_v16 = vadd.f32 0.05243302, %v1798_v10  ;;  %vm1582_vm2 = vmor %vm1580_vm1, %vm1581_vm15 }
 0x2b1   : > { %v1811_v57 = vmul.f32 %v1810_v48, %v3174_v25  ;;  %v1587_v37 = vor.u32 1.1754944e-38, %v1586_v14  ;;  %v1594_v22 = vmul.f32 2.1237322e-06, %v3231_v46  ;;  %v1605_v3 = vmul.f32 3.8918573e-05, %v3231_v46 }
 0x2b2   : > { %v2066_v0 = vclamps-f32 %v1789_v23, 1.0  ;;  %v1579_v13 = vadd.f32 %v2139_v52, %v1578_v41  ;;  %v1712_v43 = vmul.f32 %v3234_v61, %v3234_v61  ;;  %vm1585_vm3 = vcmp.eq.f32.partialorder %v1584_v42, 8.507059e+37 }
 0x2b3   : > { %v1812_v1 = vadd.f32 0.4994258, %v1811_v57  ;;  %v2141_v11 = vpop.eup %2140  ;;  %v1595_v20 = vadd.f32 0.00028619796, %v1594_v22  ;;  %v1606_v21 = vadd.f32 0.001143296, %v1605_v3  ;;  %v1800_v59 = vmul.f32 %v1799_v16, %v3174_v25 }
 0x2b4   : > { %v1877_v4 = vadd.f32 1.0, %v2066_v0  ;;  %v1583_v62 = vsel %vm1582_vm2, %v2139_v52, %v1579_v13  ;;  %v3242_v28 = vmin.f32 %v1712_v43, 16.0  ;;  %v1683_v8 = vadd.f32 1.1283791, %v1682_v27 }
 0x2b5   : > { %v1588_v51 = vsel %vm1585_vm3, %v1587_v37, %v1583_v62  ;;  %v1696_v63 = vmul.f32 %v2141_v11, %v3219_v45  ;;  %v1813_v44 = vmul.f32 %v1812_v1, %v3174_v25  ;;  %v1607_v39 = vmul.f32 %v1606_v21, %v3231_v46 }
 0x2b6   : > { %v1885_v5 = vmul.f32 %v1877_v4, %v3167_v36  ;;  %v1589_v35 = vmul.f32 %v1588_v51, %v1564_v17  ;;  %v1596_v36 = vmul.f32 %v1595_v20, %v3231_v46  ;;  %v1714_v6 = vmul.f32 2.1237322e-06, %v3242_v28 }
 0x2b7   : > { %v1697_v50 = vsub.f32 1.0, %v1696_v63  ;;  %v1704_v18 = vand.u32 2147483647, %v3219_v45  ;;  %v1725_v60 = vmul.f32 3.8918573e-05, %v3242_v28  ;;  %v1706_v24 = vand.u32 2147483648, %v3219_v45 }
 0x2b8   : > { %1893 = vst.msk [vmem:[%s3215_s15 + $0x28] sm:$0xff] %vm287_vm0, %v1885_v5  ;;  %v2061_v12 = vclamps-f32 %v1589_v35, 1.0  ;;  %v3255_v52 = vadd.f32 1.0, %v1813_v44  ;;  %v1597_v7 = vadd.f32 0.0036580483, %v1596_v36  ;;  %vm1701_vm4 = vweird.f32 %v2141_v11 }
 0x2b9   : > { %v1608_v2 = vadd.f32 0.014752088, %v1607_v39  ;;  %v1698_v40 = vmul.f32 %v2141_v11, %v1697_v50  ;;  %v1801_v53 = vadd.f32 0.18741608, %v1800_v59  ;;  %v1715_v9 = vadd.f32 0.00028619796, %v1714_v6 }
 0x2ba   : > { %v1872_v55 = vadd.f32 1.0, %v2061_v12  ;;  %2142 = vrcp.f32 %v3255_v52  ;;  %v3259_v26 = vadd.f32 %v1519_v34, %v3083_v47  ;;  %vm1700_vm5 = vweird.f32 %v3219_v45 }
 0x2bb   : > { %v1699_v19 = vadd.f32 %v2141_v11, %v1698_v40  ;;  %v1609_v23 = vmul.f32 %v1608_v2, %v3231_v46  ;;  %v1684_v31 = vmul.f32 %v1683_v8, %v3135_v30  ;;  %vm1702_vm6 = vmor %vm1700_vm5, %vm1701_vm4  ;;  %v1707_v10 = vor.u32 1.1754944e-38, %v1706_v24 }
 0x2bc   : > { %v1880_v33 = vmul.f32 %v1872_v55, %v3187_v32  ;;  %v1598_v38 = vmul.f32 %v1597_v7, %v3231_v46  ;;  %v1726_v17 = vadd.f32 0.001143296, %v1725_v60  ;;  %vm1705_vm7 = vcmp.eq.f32.partialorder %v1704_v18, 8.507059e+37 }
 0x2bd   : > { %v1703_v42 = vsel %vm1702_vm6, %v2141_v11, %v1699_v19  ;;  %v1802_v47 = vmul.f32 %v1801_v53, %v3174_v25  ;;  %v1610_v14 = vadd.f32 0.112945676, %v1609_v23  ;;  %v1716_v0 = vmul.f32 %v1715_v9, %v3242_v28 }
 0x2be   : > { %1888 = vst.msk [vmem:[%s3215_s15] sm:$0xff] %vm287_vm0, %v1880_v33  ;;  %v1708_v32 = vsel %vm1705_vm7, %v1707_v10, %v1703_v42  ;;  %v1727_v45 = vmul.f32 %v1726_v17, %v3242_v28  ;;  %v3272_v41 = vmul.f32 0.70710677, %v3259_v26  ;;  %v1599_v4 = vadd.f32 0.05243302, %v1598_v38 }
 0x2bf   : > { %v1709_v30 = vmul.f32 %v1708_v32, %v1684_v31  ;;  %v1611_v48 = vmul.f32 %v1610_v14, %v3231_v46  ;;  %v1539_v25 = vmul.f32 0.5, %v3128_v15  ;;  %v1803_v37 = vadd.f32 1.1283791, %v1802_v47 }
 0x2c0   : > { %v2143_v27 = vpop.eup %2142  ;;  %v1728_v13 = vadd.f32 0.014752088, %v1727_v45  ;;  %v1832_v16 = vmul.f32 %v3272_v41, %v3272_v41  ;;  %v1717_v43 = vadd.f32 0.0036580483, %v1716_v0  ;;  %v1824_v51 = vand.u32 2147483647, %v3255_v52 }
 0x2c1   : > { %v2064_v57 = vclamps-f32 %v1709_v30, 1.0  ;;  %v1816_v22 = vmul.f32 %v2143_v27, %v3255_v52  ;;  %v1612_v3 = vadd.f32 0.4994258, %v1611_v48  ;;  %v1826_v20 = vand.u32 2147483648, %v3255_v52 }
 0x2c2   : > { %v1729_v5 = vmul.f32 %v1728_v13, %v3242_v28  ;;  %v3280_v62 = vmin.f32 %v1832_v16, 16.0  ;;  %v1600_v21 = vmul.f32 %v1599_v4, %v3231_v46  ;;  %vm1821_vm8 = vweird.f32 %v2143_v27 }
 0x2c3   : > { %v1875_v1 = vadd.f32 1.0, %v2064_v57  ;;  %v1817_v11 = vsub.f32 1.0, %v1816_v22  ;;  %v1613_v15 = vmul.f32 %v1612_v3, %v3231_v46  ;;  %v1718_v39 = vmul.f32 %v1717_v43, %v3242_v28 }
 0x2c4   : > { %v1730_v35 = vadd.f32 0.112945676, %v1729_v5  ;;  %v1834_v8 = vmul.f32 2.1237322e-06, %v3280_v62  ;;  %v1845_v44 = vmul.f32 3.8918573e-05, %v3280_v62  ;;  %vm1820_vm9 = vweird.f32 %v3255_v52 }
 0x2c5   : > { %v1883_v63 = vmul.f32 %v1875_v1, %v1539_v25  ;;  %v1818_v59 = vmul.f32 %v2143_v27, %v1817_v11  ;;  %v1614_v36 = vadd.f32 1.0, %v1613_v15  ;;  %v1804_v60 = vmul.f32 %v1803_v37, %v3155_v58  ;;  %vm1822_vm10 = vmor %vm1820_vm9, %vm1821_vm8 }
 0x2c6   : > { %v1731_v6 = vmul.f32 %v1730_v35, %v3242_v28  ;;  %v1835_v12 = vadd.f32 0.00028619796, %v1834_v8  ;;  %v1846_v18 = vadd.f32 0.001143296, %v1845_v44  ;;  %v1827_v34 = vor.u32 1.1754944e-38, %v1826_v20 }
 0x2c7   : > { %1891 = vst.msk [vmem:[%s3215_s15 + $0x18] sm:$0xff] %vm287_vm0, %v1883_v63  ;;  %v1819_v50 = vadd.f32 %v2143_v27, %v1818_v59  ;;  %2144 = vrcp.f32 %v1614_v36  ;;  %vm1825_vm11 = vcmp.eq.f32.partialorder %v1824_v51, 8.507059e+37  ;;  %v1601_v40 = vadd.f32 0.18741608, %v1600_v21 }
 0x2c8   : > { %v1732_v7 = vadd.f32 0.4994258, %v1731_v6  ;;  %v1836_v2 = vmul.f32 %v1835_v12, %v3280_v62  ;;  %v1719_v53 = vadd.f32 0.05243302, %v1718_v39  ;;  %v1847_v9 = vmul.f32 %v1846_v18, %v3280_v62 }
 0x2c9   : > { %v1823_v24 = vsel %vm1822_vm10, %v2143_v27, %v1819_v50  ;;  %v1602_v38 = vmul.f32 %v1601_v40, %v3231_v46  ;;  %v1542_v47 = vmul.f32 0.5, %v3146_v29  ;;  %v1626_v4 = vand.u32 2147483648, %v1614_v36 }
 0x2ca   : > { %v1828_v55 = vsel %vm1825_vm11, %v1827_v34, %v1823_v24  ;;  %v1733_v19 = vmul.f32 %v1732_v7, %v3242_v28  ;;  %v1848_v52 = vadd.f32 0.014752088, %v1847_v9  ;;  %v1837_v58 = vadd.f32 0.0036580483, %v1836_v2 }
 0x2cb   : > { %v1829_v33 = vmul.f32 %v1828_v55, %v1804_v60  ;;  %v1720_v17 = vmul.f32 %v1719_v53, %v3242_v28  ;;  %v1603_v27 = vadd.f32 1.1283791, %v1602_v38  ;;  %v1624_v16 = vand.u32 2147483647, %v1614_v36 }
 0x2cc   : > { %v1734_v31 = vadd.f32 1.0, %v1733_v19  ;;  %v1849_v42 = vmul.f32 %v1848_v52, %v3280_v62  ;;  %v1838_v30 = vmul.f32 %v1837_v58, %v3280_v62  ;;  %vm1620_vm13 = vweird.f32 %v1614_v36 }
 0x2cd   : > { %v2067_v23 = vclamps-f32 %v1829_v33, 1.0  ;;  %v2145_v10 = vpop.eup %2144  ;;  %v1721_v13 = vadd.f32 0.18741608, %v1720_v17  ;;  %v1627_v3 = vor.u32 1.1754944e-38, %v1626_v4  ;;  %v1604_v1 = vmul.f32 %v1603_v27, %v3206_v54 }
 0x2ce   : > { %v1616_v32 = vmul.f32 %v2145_v10, %v1614_v36  ;;  %2146 = vrcp.f32 %v1734_v31  ;;  %v1850_v48 = vadd.f32 0.112945676, %v1849_v42  ;;  %vm1621_vm12 = vweird.f32 %v2145_v10 }
 0x2cf   : > { %v1878_v14 = vadd.f32 1.0, %v2067_v23  ;;  %v1839_v37 = vadd.f32 0.05243302, %v1838_v30  ;;  %vm1622_vm14 = vmor %vm1620_vm13, %vm1621_vm12  ;;  %v1722_v43 = vmul.f32 %v1721_v13, %v3242_v28  ;;  %vm1625_vm15 = vcmp.eq.f32.partialorder %v1624_v16, 8.507059e+37 }
 0x2d0   : > { %v1617_v45 = vsub.f32 1.0, %v1616_v32  ;;  %v1851_v25 = vmul.f32 %v1850_v48, %v3280_v62  ;;  %v1746_v35 = vand.u32 2147483648, %v1734_v31  ;;  %v1744_v36 = vand.u32 2147483647, %v1734_v31 }
 0x2d1   : > { %v1886_v0 = vmul.f32 %v1878_v14, %v1542_v47  ;;  %v1840_v8 = vmul.f32 %v1839_v37, %v3280_v62  ;;  %v1723_v59 = vadd.f32 1.1283791, %v1722_v43  ;;  %vm1740_vm2 = vweird.f32 %v1734_v31 }
 0x2d2   : > { %v1618_v46 = vmul.f32 %v2145_v10, %v1617_v45  ;;  %v1852_v22 = vadd.f32 0.4994258, %v1851_v25  ;;  %v1537_v54 = vmul.f32 0.5, %v3190_v56  ;;  %v1747_v12 = vor.u32 1.1754944e-38, %v1746_v35 }
 0x2d3   : > { %1894 = vst.msk [vmem:[%s3215_s15 + $0x30] sm:$0xff] %vm287_vm0, %v1886_v0  ;;  %v1841_v50 = vadd.f32 0.18741608, %v1840_v8  ;;  %v1724_v18 = vmul.f32 %v1723_v59, %v3234_v61  ;;  %vm1745_vm4 = vcmp.eq.f32.partialorder %v1744_v36, 8.507059e+37  ;;  %v1540_v53 = vmul.f32 0.5, %v3213_v49 }
 0x2d4   : > { %v2147_v57 = vpop.eup %2146  ;;  %v1619_v29 = vadd.f32 %v2145_v10, %v1618_v46  ;;  %v1853_v51 = vmul.f32 %v1852_v22, %v3280_v62  ;;  %v1543_v47 = vmul.f32 0.5, %v3259_v26 }
 0x2d5   : > { %v1736_v5 = vmul.f32 %v2147_v57, %v1734_v31  ;;  %vm1741_vm1 = vweird.f32 %v2147_v57  ;;  %v1842_v55 = vmul.f32 %v1841_v50, %v3280_v62 }
 0x2d6   : > { %v1623_v11 = vsel %vm1622_vm14, %v2145_v10, %v1619_v29  ;;  %v1854_v63 = vadd.f32 1.0, %v1853_v51  ;;  %vm1742_vm3 = vmor %vm1740_vm2, %vm1741_vm1 }
 0x2d7   : > { %v1628_v20 = vsel %vm1625_vm15, %v1627_v3, %v1623_v11  ;;  %v1737_v21 = vsub.f32 1.0, %v1736_v5  ;;  %v1843_v19 = vadd.f32 1.1283791, %v1842_v55 }
 0x2d8   : > { %v1629_v15 = vmul.f32 %v1628_v20, %v1604_v1  ;;  %2148 = vrcp.f32 %v1854_v63  ;;  %v1866_v61 = vand.u32 2147483648, %v1854_v63  ;;  %v1864_v31 = vand.u32 2147483647, %v1854_v63 }
 0x2d9   : > { %v1738_v44 = vmul.f32 %v2147_v57, %v1737_v21  ;;  %vm1860_vm6 = vweird.f32 %v1854_v63  ;;  %v1844_v49 = vmul.f32 %v1843_v19, %v3272_v41 }
 0x2da   : > { %v2062_v39 = vclamps-f32 %v1629_v15, 1.0  ;;  %v1867_v62 = vor.u32 1.1754944e-38, %v1866_v61  ;;  %vm1865_vm8 = vcmp.eq.f32.partialorder %v1864_v31, 8.507059e+37 }
 0x2db   : > { %v1739_v28 = vadd.f32 %v2147_v57, %v1738_v44 }
 0x2dc   : > { %v1873_v6 = vadd.f32 1.0, %v2062_v39 }
 0x2dd   : > { %v1743_v60 = vsel %vm1742_vm3, %v2147_v57, %v1739_v28 }
 0x2de   : > { %v1881_v34 = vmul.f32 %v1873_v6, %v1537_v54  ;;  %v1748_v24 = vsel %vm1745_vm4, %v1747_v12, %v1743_v60  ;;  %v2149_v2 = vpop.eup %2148 }
 0x2df   : > { %v1749_v7 = vmul.f32 %v1748_v24, %v1724_v18  ;;  %v1856_v56 = vmul.f32 %v2149_v2, %v1854_v63  ;;  %vm1861_vm5 = vweird.f32 %v2149_v2 }
 0x2e0   : > { %1889 = vst.msk [vmem:[%s3215_s15 + $0x8] sm:$0xff] %vm287_vm0, %v1881_v34  ;;  %vm1862_vm7 = vmor %vm1860_vm6, %vm1861_vm5 }
 0x2e1   : > { %v2065_v40 = vclamps-f32 %v1749_v7, 1.0  ;;  %v1857_v33 = vsub.f32 1.0, %v1856_v56 }
 0x2e3   : > { %v1876_v9 = vadd.f32 1.0, %v2065_v40  ;;  %v1858_v23 = vmul.f32 %v2149_v2, %v1857_v33 }
 0x2e5   : > { %v1884_v52 = vmul.f32 %v1876_v9, %v1540_v53  ;;  %v1859_v58 = vadd.f32 %v2149_v2, %v1858_v23 }
 0x2e7   : > { %1892 = vst.msk [vmem:[%s3215_s15 + $0x20] sm:$0xff] %vm287_vm0, %v1884_v52  ;;  %v1863_v10 = vsel %vm1862_vm7, %v2149_v2, %v1859_v58 }
 0x2e8   : > { %v1868_v38 = vsel %vm1865_vm8, %v1867_v62, %v1863_v10 }
 0x2e9   : > { %v1869_v17 = vmul.f32 %v1868_v38, %v1844_v49 }
 0x2eb   : > { %v2068_v42 = vclamps-f32 %v1869_v17, 1.0 }
 0x2ed   : > { %v1879_v14 = vadd.f32 1.0, %v2068_v42 }
 0x2ef   : > { %v1887_v32 = vmul.f32 %v1879_v14, %v1543_v47 }
 0x2f1   : > { %1895 = vst.msk [vmem:[%s3215_s15 + $0x38] sm:$0xff] %vm287_vm0, %v1887_v32 }
 0x2f2   : > { %2177 = shalt.err (!%p2174_p3)
}
 0x2f3   : > { %s2218_s8 = smov 128   ;;  %s2219_s15 = smov 8  }
 0x2f4   : > { %2086 = dma.vmem_to_hbm [thread:$0]  (%p2298_p5), %s1910_s20, 1024, %s1912_s21, %s1897_s28, %s2218_s8, %s2218_s8, %s2219_s15  }
 0x2f5 PF: > { %p2092_p4 = scmp.ge.s32.totalorder %s2212_s27, 2  ;;  %s1926_s17 = sand.u32 1, %s2200_s24  }
 0x2f6   : > { %s1927_s18 = scalar_lea.sflag [#allocation3], %s1926_s17 }
 0x2f7   : > { %p2089_p7 = pnand %p2092_p4, %p2302_p6 }
 0x2f9   : > { %p2090_p8 = pneg %p2089_p7 }
 0x2fb   : > { %2195 = dma.done.wait (%p2090_p8), %s1927_s18, 1024  }
 0x2fc   : > { %2197 = vsyncadd (%p2090_p8), %s1927_s18, 4294966272  ;;  %p17_p9 = scmp.ge.s32.totalorder %s2285_s30, 4   ;;  %s3389_s24 = smov %s2204_s25 }
 0x2fd   : > { %s3390_s25 = smov %s2208_s26  ;;  %s3391_s26 = smov %s2296_s10 }
 0x2fe   : > { %s3392_s27 = smov %s2285_s30  ;;  %19 = sbr.rel (!%p17_p9) target bundleno = 3 (0x3), region = 91 }
 0x303   :  { %1933 = vsyncpa [#allocation3], 1 }
 0x304   :  { %1935 = vsyncpa [#allocation3 + $0x1], 1 }

</bundles_post_ra>
